<compile_context>
chip_gen: v6e
topology: v6e:2x2x1
jax: 0.10.0
libtpu: 0.0.40
codegen_flags: <defaults>
</compile_context>

<pallas_src>
import functools

import jax
import jax.numpy as jnp
from jax.experimental import pallas as pl
from jax.experimental.pallas import tpu as pltpu

LANE = 128          # lane-dense channel padding (full v5e MXU width)
ONES_COL = LANE - 1  # padded lane used to carry the bias through the MXU


def _ru(v, m):
    return ((v + m - 1) // m) * m


def _elu(h):
    # ELU(alpha=1): x if x > 0 else exp(x) - 1  (min-guarded exp)
    return jnp.where(h > 0, h, jnp.exp(jnp.minimum(h, 0.0)) - 1.0)


# -----------------------------------------------------------------------------
# Fused kernel: 3 x (aggregate -> linear(+bias via ones-column) -> BN shift ->
# ELU) -> global mean pool -> output linear -> log_softmax.
# Everything is VMEM-resident; intermediates stay in bf16, accumulation in f32.
# -----------------------------------------------------------------------------
def fused_kernel(a_ref, x_ref, w1_ref, t1_ref, w2_ref, t2_ref, w3_ref, t3_ref,
                 p_ref, wout_ref, bout_ref, out_ref):
    a = a_ref[...]  # [n_p, n_p] bf16, mean-normalized adjacency

    def mp(prev_bf16, w_ref, t_ref, add_ones_col):
        # Aggregation: (A @ prev) on MXU, f32 accumulate. The ones column of
        # prev turns into the in-degree indicator (A rows sum to 1 or 0).
        agg = jnp.dot(a, prev_bf16, preferred_element_type=jnp.float32)
        # Linear (BN scale folded into W, bias folded into row ONES_COL).
        h = jnp.dot(agg.astype(jnp.bfloat16), w_ref[...],
                    preferred_element_type=jnp.float32)
        h = _elu(h + t_ref[...])  # BN (eval) additive shift, then ELU
        if add_ones_col:
            col = jax.lax.broadcasted_iota(jnp.int32, h.shape, 1)
            h = jnp.where(col == ONES_COL, 1.0, h)
        return h.astype(jnp.bfloat16)

    h1 = mp(x_ref[...], w1_ref, t1_ref, True)
    h2 = mp(h1, w2_ref, t2_ref, True)
    h3 = mp(h2, w3_ref, t3_ref, False)

    # Global mean pool + output linear + log_softmax (kept in f32: the -1e30
    # padded-logit bias must not be narrowed to bf16).
    g = jnp.dot(p_ref[...], h3, preferred_element_type=jnp.float32)
    y = jnp.dot(g.astype(jnp.bfloat16), wout_ref[...],
                preferred_element_type=jnp.float32) + bout_ref[...]
    m = jnp.max(y, axis=1, keepdims=True)
    z = y - m
    lse = jnp.log(jnp.sum(jnp.exp(z), axis=1, keepdims=True))
    out_ref[...] = z - lse


def mg_fused(a, x, w1, t1, w2, t2, w3, t3, p, wout, bout):
    g_p = p.shape[0]
    cout_p = wout.shape[1]
    inputs = (a, x, w1, t1, w2, t2, w3, t3, p, wout, bout)
    resident = sum(int(v.size) * v.dtype.itemsize for v in inputs)
    resident += g_p * cout_p * 4  # output
    vmem_limit = min(resident + (4 << 20), 56 << 20)  # clamp under v7x budget
    return pl.pallas_call(
        fused_kernel,
        out_shape=jax.ShapeDtypeStruct((g_p, cout_p), jnp.float32),
        in_specs=[pl.BlockSpec(memory_space=pltpu.MemorySpace.VMEM)
                  for _ in inputs],
        out_specs=pl.BlockSpec(memory_space=pltpu.MemorySpace.VMEM),
        compiler_params=pltpu.CompilerParams(vmem_limit_bytes=vmem_limit),
    )(*inputs)


# -----------------------------------------------------------------------------
# Wrapper: padding / BN folding / bias-row insertion (glue) + the pallas_call.
# -----------------------------------------------------------------------------
def mg_model_forward(x, a_norm, pool_mat, params):
    n, c_in = x.shape
    n_graphs = pool_mat.shape[0]
    h1c = params["w1"].shape[1]
    h2c = params["w2"].shape[1]
    h3c = params["w3"].shape[1]
    c_out = params["wout"].shape[1]
    # the ones-column trick needs a free padded lane in every feature width
    assert max(c_in, h1c, h2c, h3c) < LANE

    n_p = _ru(max(n, 8), LANE)
    cin_p, h1_p, h2_p, h3_p = (_ru(c, LANE) for c in (c_in, h1c, h2c, h3c))
    cout_p = _ru(c_out, LANE)
    g_p = _ru(n_graphs, 8)

    def pad2(arr, r, c):
        return jnp.pad(arr, ((0, r - arr.shape[0]), (0, c - arr.shape[1])))

    # Inputs: zero-padded nodes/channels are exact (zero rows/cols of A and P
    # never contribute; zero weight rows/cols keep padded channels at 0).
    a_p = pad2(a_norm, n_p, n_p).astype(jnp.bfloat16)
    x_p = pad2(x, n_p, cin_p).at[:, ONES_COL].set(1.0).astype(jnp.bfloat16)
    p_p = pad2(pool_mat, g_p, n_p).astype(jnp.bfloat16)

    # Fold BN (eval) scale into the linear:  s*(A@(xW+b)) = A@(x(W*s)+(b*s));
    # the scaled bias goes into weight row ONES_COL (matched by the ones lane
    # of the features), the BN shift t stays additive.
    def fold_w(w, bvec, s, t, rin_p, c_out_pad):
        wp = jnp.zeros((rin_p, c_out_pad), jnp.float32)
        wp = wp.at[:w.shape[0], :w.shape[1]].set(w * s)
        wp = wp.at[ONES_COL, :w.shape[1]].set((bvec * s)[0])
        return wp.astype(jnp.bfloat16), pad2(t, 1, c_out_pad)

    w1, t1 = fold_w(params["w1"], params["b1"], params["s1"], params["t1"],
                    cin_p, h1_p)
    w2, t2 = fold_w(params["w2"], params["b2"], params["s2"], params["t2"],
                    h1_p, h2_p)
    w3, t3 = fold_w(params["w3"], params["b3"], params["s3"], params["t3"],
                    h2_p, h3_p)
    wout = pad2(params["wout"], h3_p, cout_p).astype(jnp.bfloat16)
    bout = jnp.full((1, cout_p), -1e30, jnp.float32).at[:, :c_out].set(
        params["bout"])

    # dropout is identity in eval mode.
    # TODO(synk): training-mode dropout would need pltpu.prng_* inside the kernel.
    log_probs = mg_fused(a_p, x_p, w1, t1, w2, t2, w3, t3, p_p, wout, bout)
    # l1_norm is computed in the PyTorch module but l1_reg returned is 0.
    return log_probs[:n_graphs, :c_out], 0.0


# -----------------------------------------------------------------------------
# Synthetic parameters / inputs (module __init__ defines the shapes).
# -----------------------------------------------------------------------------
def fold_bn(gamma, beta, running_mean, running_var, eps=1e-5):
    scale = gamma / jnp.sqrt(running_var + eps)
    shift = beta - running_mean * scale
    return scale[None, :], shift[None, :]


def build_params(key, in_channels, hidden_channels, out_channels):
    ks = jax.random.split(key, 20)

    def lin(kw, kb, fan_in, fan_out):
        bound = 1.0 / jnp.sqrt(fan_in)
        w = jax.random.uniform(kw, (fan_in, fan_out), jnp.float32, -bound, bound)
        b = jax.random.uniform(kb, (1, fan_out), jnp.float32, -bound, bound)
        return w, b

    h, h2 = hidden_channels, 2 * hidden_channels
    w1, b1 = lin(ks[0], ks[1], in_channels, h)
    w2, b2 = lin(ks[2], ks[3], h, h)
    w3, b3 = lin(ks[4], ks[5], h, h2)
    wout, bout = lin(ks[6], ks[7], h2, out_channels)

    def bn(kg, kb, km, kv, c):
        gamma = 1.0 + 0.1 * jax.random.normal(kg, (c,), jnp.float32)
        beta = 0.1 * jax.random.normal(kb, (c,), jnp.float32)
        rmean = 0.1 * jax.random.normal(km, (c,), jnp.float32)
        rvar = 1.0 + 0.1 * jax.random.uniform(kv, (c,), jnp.float32)
        return fold_bn(gamma, beta, rmean, rvar)

    s1, t1 = bn(ks[8], ks[9], ks[10], ks[11], h)
    s2, t2 = bn(ks[12], ks[13], ks[14], ks[15], h)
    s3, t3 = bn(ks[16], ks[17], ks[18], ks[19], h2)

    return dict(w1=w1, b1=b1, s1=s1, t1=t1,
                w2=w2, b2=b2, s2=s2, t2=t2,
                w3=w3, b3=b3, s3=s3, t3=t3,
                wout=wout, bout=bout)


def build_graph_inputs(key, num_nodes, num_edges, num_graphs, in_channels):
    kx, ke, _ = jax.random.split(key, 3)
    x = jax.random.normal(kx, (num_nodes, in_channels), jnp.float32)

    src = jax.random.randint(ke, (num_edges,), 0, num_nodes)
    dst = jax.random.randint(jax.random.fold_in(ke, 1), (num_edges,), 0, num_nodes)

    # Dense mean-normalized adjacency: A[i, j] = count(j->i) / in_deg(i)
    counts = jnp.zeros((num_nodes, num_nodes), jnp.float32).at[dst, src].add(1.0)
    in_deg = counts.sum(axis=1, keepdims=True)
    a_norm = jnp.where(in_deg > 0, counts / jnp.maximum(in_deg, 1.0), 0.0)

    nodes_per_graph = num_nodes // num_graphs
    batch = jnp.repeat(jnp.arange(num_graphs), nodes_per_graph)
    batch = jnp.concatenate(
        [batch, jnp.full((num_nodes - batch.shape[0],), num_graphs - 1, batch.dtype)])

    onehot = (batch[None, :] == jnp.arange(num_graphs)[:, None]).astype(jnp.float32)
    pool_mat = onehot / jnp.maximum(onehot.sum(axis=1, keepdims=True), 1.0)
    return x, a_norm, pool_mat


if __name__ == "__main__":
    in_channels = 8
    hidden_channels = 16
    out_channels = 4
    num_nodes = 24
    num_edges = 64
    num_graphs = 2

    key = jax.random.PRNGKey(0)
    kp, kg = jax.random.split(key)

    params = build_params(kp, in_channels, hidden_channels, out_channels)
    x, a_norm, pool_mat = build_graph_inputs(
        kg, num_nodes, num_edges, num_graphs, in_channels)

    fwd = jax.jit(mg_model_forward)
    log_probs, l1_reg = fwd(x, a_norm, pool_mat, params)
    jax.block_until_ready(log_probs)

    assert log_probs.shape == (num_graphs, out_channels)
    assert bool(jnp.all(jnp.isfinite(log_probs)))
    # rows of log_softmax must sum to 1 in prob space
    assert bool(jnp.allclose(jnp.exp(log_probs).sum(axis=1), 1.0, atol=1e-3))
    print("KERNEL_OK")
</pallas_src>

<mosaic_0001>
module attributes {stable_mosaic.version = 11 : i64} {
  func.func @fused_kernel(%arg0: memref<128x128xbf16, #tpu.memory_space<vmem>>, %arg1: memref<128x128xbf16, #tpu.memory_space<vmem>>, %arg2: memref<128x128xbf16, #tpu.memory_space<vmem>>, %arg3: memref<1x128xf32, #tpu.memory_space<vmem>>, %arg4: memref<128x128xbf16, #tpu.memory_space<vmem>>, %arg5: memref<1x128xf32, #tpu.memory_space<vmem>>, %arg6: memref<128x128xbf16, #tpu.memory_space<vmem>>, %arg7: memref<1x128xf32, #tpu.memory_space<vmem>>, %arg8: memref<8x128xbf16, #tpu.memory_space<vmem>>, %arg9: memref<128x128xbf16, #tpu.memory_space<vmem>>, %arg10: memref<1x128xf32, #tpu.memory_space<vmem>>, %arg11: memref<8x128xf32, #tpu.memory_space<vmem>>) attributes {dimension_semantics = [], scalar_prefetch = 0 : i64, scratch_operands = 0 : i64, tpu.core_type = #tpu.core_type<tc>} {
    %c0 = arith.constant 0 : index
    %c0_0 = arith.constant 0 : index
    %0 = vector.load %arg0[%c0, %c0_0] : memref<128x128xbf16, #tpu.memory_space<vmem>>, vector<128x128xbf16>
    %c0_1 = arith.constant 0 : index
    %c0_2 = arith.constant 0 : index
    %1 = vector.load %arg1[%c0_1, %c0_2] : memref<128x128xbf16, #tpu.memory_space<vmem>>, vector<128x128xbf16>
    %cst = arith.constant dense<0.000000e+00> : vector<128x128xf32>
    %2 = tpu.matmul %0, %1, %cst {dimension_numbers = #tpu.dot_dimension_numbers<[1], [0], [0], [1], [0, 0, 1, 1], [], []>} : vector<128x128xbf16>, vector<128x128xbf16>, vector<128x128xf32> -> vector<128x128xf32>
    %3 = arith.truncf %2 : vector<128x128xf32> to vector<128x128xbf16>
    %c0_3 = arith.constant 0 : index
    %c0_4 = arith.constant 0 : index
    %4 = vector.load %arg2[%c0_3, %c0_4] : memref<128x128xbf16, #tpu.memory_space<vmem>>, vector<128x128xbf16>
    %cst_5 = arith.constant dense<0.000000e+00> : vector<128x128xf32>
    %5 = tpu.matmul %3, %4, %cst_5 {dimension_numbers = #tpu.dot_dimension_numbers<[1], [0], [0], [1], [0, 0, 1, 1], [], []>} : vector<128x128xbf16>, vector<128x128xbf16>, vector<128x128xf32> -> vector<128x128xf32>
    %c0_6 = arith.constant 0 : index
    %c0_7 = arith.constant 0 : index
    %6 = vector.load %arg3[%c0_6, %c0_7] : memref<1x128xf32, #tpu.memory_space<vmem>>, vector<1x128xf32>
    %7 = vector.broadcast %6 : vector<1x128xf32> to vector<128x128xf32>
    %8 = arith.addf %5, %7 : vector<128x128xf32>
    %cst_8 = arith.constant 0.000000e+00 : f32
    %9 = vector.broadcast %cst_8 : f32 to vector<128x128xf32>
    %10 = arith.cmpf ogt, %8, %9 : vector<128x128xf32>
    %cst_9 = arith.constant 0.000000e+00 : f32
    %11 = vector.broadcast %cst_9 : f32 to vector<128x128xf32>
    %12 = arith.minimumf %8, %11 : vector<128x128xf32>
    %13 = math.exp %12 : vector<128x128xf32>
    %cst_10 = arith.constant 1.000000e+00 : f32
    %14 = vector.broadcast %cst_10 : f32 to vector<128x128xf32>
    %15 = arith.subf %13, %14 : vector<128x128xf32>
    %16 = arith.select %10, %8, %15 : vector<128x128xi1>, vector<128x128xf32>
    %17 = tpu.iota {dimensions = array<i32: 1>} : vector<128x128xi32>
    %c127_i32 = arith.constant 127 : i32
    %18 = vector.broadcast %c127_i32 : i32 to vector<128x128xi32>
    %19 = arith.cmpi eq, %17, %18 : vector<128x128xi32>
    %cst_11 = arith.constant 1.000000e+00 : f32
    %20 = vector.broadcast %cst_11 : f32 to vector<128x128xf32>
    %21 = arith.select %19, %20, %16 : vector<128x128xi1>, vector<128x128xf32>
    %22 = arith.truncf %21 : vector<128x128xf32> to vector<128x128xbf16>
    %cst_12 = arith.constant dense<0.000000e+00> : vector<128x128xf32>
    %23 = tpu.matmul %0, %22, %cst_12 {dimension_numbers = #tpu.dot_dimension_numbers<[1], [0], [0], [1], [0, 0, 1, 1], [], []>} : vector<128x128xbf16>, vector<128x128xbf16>, vector<128x128xf32> -> vector<128x128xf32>
    %24 = arith.truncf %23 : vector<128x128xf32> to vector<128x128xbf16>
    %c0_13 = arith.constant 0 : index
    %c0_14 = arith.constant 0 : index
    %25 = vector.load %arg4[%c0_13, %c0_14] : memref<128x128xbf16, #tpu.memory_space<vmem>>, vector<128x128xbf16>
    %cst_15 = arith.constant dense<0.000000e+00> : vector<128x128xf32>
    %26 = tpu.matmul %24, %25, %cst_15 {dimension_numbers = #tpu.dot_dimension_numbers<[1], [0], [0], [1], [0, 0, 1, 1], [], []>} : vector<128x128xbf16>, vector<128x128xbf16>, vector<128x128xf32> -> vector<128x128xf32>
    %c0_16 = arith.constant 0 : index
    %c0_17 = arith.constant 0 : index
    %27 = vector.load %arg5[%c0_16, %c0_17] : memref<1x128xf32, #tpu.memory_space<vmem>>, vector<1x128xf32>
    %28 = vector.broadcast %27 : vector<1x128xf32> to vector<128x128xf32>
    %29 = arith.addf %26, %28 : vector<128x128xf32>
    %cst_18 = arith.constant 0.000000e+00 : f32
    %30 = vector.broadcast %cst_18 : f32 to vector<128x128xf32>
    %31 = arith.cmpf ogt, %29, %30 : vector<128x128xf32>
    %cst_19 = arith.constant 0.000000e+00 : f32
    %32 = vector.broadcast %cst_19 : f32 to vector<128x128xf32>
    %33 = arith.minimumf %29, %32 : vector<128x128xf32>
    %34 = math.exp %33 : vector<128x128xf32>
    %cst_20 = arith.constant 1.000000e+00 : f32
    %35 = vector.broadcast %cst_20 : f32 to vector<128x128xf32>
    %36 = arith.subf %34, %35 : vector<128x128xf32>
    %37 = arith.select %31, %29, %36 : vector<128x128xi1>, vector<128x128xf32>
    %38 = tpu.iota {dimensions = array<i32: 1>} : vector<128x128xi32>
    %c127_i32_21 = arith.constant 127 : i32
    %39 = vector.broadcast %c127_i32_21 : i32 to vector<128x128xi32>
    %40 = arith.cmpi eq, %38, %39 : vector<128x128xi32>
    %cst_22 = arith.constant 1.000000e+00 : f32
    %41 = vector.broadcast %cst_22 : f32 to vector<128x128xf32>
    %42 = arith.select %40, %41, %37 : vector<128x128xi1>, vector<128x128xf32>
    %43 = arith.truncf %42 : vector<128x128xf32> to vector<128x128xbf16>
    %cst_23 = arith.constant dense<0.000000e+00> : vector<128x128xf32>
    %44 = tpu.matmul %0, %43, %cst_23 {dimension_numbers = #tpu.dot_dimension_numbers<[1], [0], [0], [1], [0, 0, 1, 1], [], []>} : vector<128x128xbf16>, vector<128x128xbf16>, vector<128x128xf32> -> vector<128x128xf32>
    %45 = arith.truncf %44 : vector<128x128xf32> to vector<128x128xbf16>
    %c0_24 = arith.constant 0 : index
    %c0_25 = arith.constant 0 : index
    %46 = vector.load %arg6[%c0_24, %c0_25] : memref<128x128xbf16, #tpu.memory_space<vmem>>, vector<128x128xbf16>
    %cst_26 = arith.constant dense<0.000000e+00> : vector<128x128xf32>
    %47 = tpu.matmul %45, %46, %cst_26 {dimension_numbers = #tpu.dot_dimension_numbers<[1], [0], [0], [1], [0, 0, 1, 1], [], []>} : vector<128x128xbf16>, vector<128x128xbf16>, vector<128x128xf32> -> vector<128x128xf32>
    %c0_27 = arith.constant 0 : index
    %c0_28 = arith.constant 0 : index
    %48 = vector.load %arg7[%c0_27, %c0_28] : memref<1x128xf32, #tpu.memory_space<vmem>>, vector<1x128xf32>
    %49 = vector.broadcast %48 : vector<1x128xf32> to vector<128x128xf32>
    %50 = arith.addf %47, %49 : vector<128x128xf32>
    %cst_29 = arith.constant 0.000000e+00 : f32
    %51 = vector.broadcast %cst_29 : f32 to vector<128x128xf32>
    %52 = arith.cmpf ogt, %50, %51 : vector<128x128xf32>
    %cst_30 = arith.constant 0.000000e+00 : f32
    %53 = vector.broadcast %cst_30 : f32 to vector<128x128xf32>
    %54 = arith.minimumf %50, %53 : vector<128x128xf32>
    %55 = math.exp %54 : vector<128x128xf32>
    %cst_31 = arith.constant 1.000000e+00 : f32
    %56 = vector.broadcast %cst_31 : f32 to vector<128x128xf32>
    %57 = arith.subf %55, %56 : vector<128x128xf32>
    %58 = arith.select %52, %50, %57 : vector<128x128xi1>, vector<128x128xf32>
    %59 = arith.truncf %58 : vector<128x128xf32> to vector<128x128xbf16>
    %c0_32 = arith.constant 0 : index
    %c0_33 = arith.constant 0 : index
    %60 = vector.load %arg8[%c0_32, %c0_33] : memref<8x128xbf16, #tpu.memory_space<vmem>>, vector<8x128xbf16>
    %cst_34 = arith.constant dense<0.000000e+00> : vector<8x128xf32>
    %61 = tpu.matmul %60, %59, %cst_34 {dimension_numbers = #tpu.dot_dimension_numbers<[1], [0], [0], [1], [0, 0, 1, 1], [], []>} : vector<8x128xbf16>, vector<128x128xbf16>, vector<8x128xf32> -> vector<8x128xf32>
    %62 = arith.truncf %61 : vector<8x128xf32> to vector<8x128xbf16>
    %c0_35 = arith.constant 0 : index
    %c0_36 = arith.constant 0 : index
    %63 = vector.load %arg9[%c0_35, %c0_36] : memref<128x128xbf16, #tpu.memory_space<vmem>>, vector<128x128xbf16>
    %cst_37 = arith.constant dense<0.000000e+00> : vector<8x128xf32>
    %64 = tpu.matmul %62, %63, %cst_37 {dimension_numbers = #tpu.dot_dimension_numbers<[1], [0], [0], [1], [0, 0, 1, 1], [], []>} : vector<8x128xbf16>, vector<128x128xbf16>, vector<8x128xf32> -> vector<8x128xf32>
    %c0_38 = arith.constant 0 : index
    %c0_39 = arith.constant 0 : index
    %65 = vector.load %arg10[%c0_38, %c0_39] : memref<1x128xf32, #tpu.memory_space<vmem>>, vector<1x128xf32>
    %66 = vector.broadcast %65 : vector<1x128xf32> to vector<8x128xf32>
    %67 = arith.addf %64, %66 : vector<8x128xf32>
    %cst_40 = arith.constant dense<0xFF800000> : vector<8xf32>
    %68 = vector.multi_reduction <maximumf>, %67, %cst_40 [1] : vector<8x128xf32> to vector<8xf32>
    %69 = vector.shape_cast %68 : vector<8xf32> to vector<8x1xf32>
    %70 = vector.broadcast %69 : vector<8x1xf32> to vector<8x128xf32>
    %71 = arith.subf %67, %70 : vector<8x128xf32>
    %72 = math.exp %71 : vector<8x128xf32>
    %cst_41 = arith.constant dense<0.000000e+00> : vector<8xf32>
    %73 = vector.multi_reduction <add>, %72, %cst_41 [1] : vector<8x128xf32> to vector<8xf32>
    %74 = vector.shape_cast %73 : vector<8xf32> to vector<8x1xf32>
    %75 = math.log %74 : vector<8x1xf32>
    %76 = vector.broadcast %75 : vector<8x1xf32> to vector<8x128xf32>
    %77 = arith.subf %71, %76 : vector<8x128xf32>
    %c0_42 = arith.constant 0 : index
    %c0_43 = arith.constant 0 : index
    %78 = vector.load %arg11[%c0_42, %c0_43] : memref<8x128xf32, #tpu.memory_space<vmem>>, vector<8x128xf32>
    tpu.vector_store %arg11[%c0_42, %c0_43], %77 {strides = array<i32>} : memref<8x128xf32, #tpu.memory_space<vmem>>, vector<8x128xf32>,
    return
  }
}

</mosaic_0001>

<bundles_post_ra>
// kernel: mul.24
= control target key start
LH: loop header
LB: loop body
LE: loop exit
PB: predicated region body
PF: predicated region fallthrough
CT: control target
= control target key end

     0   :  { %v12_v3 = vmov 0.0   ;;  %s37_s0 = inlined_call_operand.vmem [shape: f32[1,16], index: 0, kind: input, shape index: {}]   ;;  %s38_s1 = inlined_call_operand.vmem [shape: f32[1,16], index: 1, kind: input, shape index: {}]   ;;  %s39_s2 = inlined_call_operand.vmem [shape: bf16[1,16], index: 2, kind: output, shape index: {}]  }
   0x1   :  { %v3_v0 = vld [vmem:[%s37_s0] sm:$0x1] }
   0x2   :  { %v4_v1 = vld [vmem:[%s38_s1] sm:$0x1] }
   0x3   :  { %v7_v2 = vmul.f32 %v4_v1, %v3_v0 }
   0x5   :  { %v9_v4 = vpack.c.bf16 %v12_v3, %v7_v2 }
   0x7   :  { %10 = vst [vmem:[%s39_s2] sm:$0x1] %v9_v4 }

// kernel: mul.29
= control target key start
LH: loop header
LB: loop body
LE: loop exit
PB: predicated region body
PF: predicated region fallthrough
CT: control target
= control target key end

     0   :  { %v12_v3 = vmov 0.0   ;;  %s37_s0 = inlined_call_operand.vmem [shape: f32[1,32], index: 0, kind: input, shape index: {}]   ;;  %s38_s1 = inlined_call_operand.vmem [shape: f32[1,32], index: 1, kind: input, shape index: {}]   ;;  %s39_s2 = inlined_call_operand.vmem [shape: bf16[1,32], index: 2, kind: output, shape index: {}]  }
   0x1   :  { %v3_v0 = vld [vmem:[%s37_s0] sm:$0x1] }
   0x2   :  { %v4_v1 = vld [vmem:[%s38_s1] sm:$0x1] }
   0x3   :  { %v7_v2 = vmul.f32 %v4_v1, %v3_v0 }
   0x5   :  { %v9_v4 = vpack.c.bf16 %v12_v3, %v7_v2 }
   0x7   :  { %10 = vst [vmem:[%s39_s2] sm:$0x1] %v9_v4 }

// kernel: mg_model_forward.1
= control target key start
LH: loop header
LB: loop body
LE: loop exit
PB: predicated region body
PF: predicated region fallthrough
CT: control target
= control target key end

     0   :  { %s2711_s1 = inlined_call_operand.vmem [shape: bf16[128,128], index: 1, kind: input, shape index: {}]   ;;  %s2712_s0 = inlined_call_operand.vmem [shape: bf16[128,128], index: 0, kind: input, shape index: {}]   ;;  %s2713_s2 = inlined_call_operand.vmem [shape: bf16[128,128], index: 2, kind: input, shape index: {}]   ;;  %s2714_s4 = inlined_call_operand.vmem [shape: bf16[128,128], index: 4, kind: input, shape index: {}]   ;;  %s2715_s3 = inlined_call_operand.vmem [shape: f32[1,128], index: 3, kind: input, shape index: {}]   ;;  %s2716_s6 = inlined_call_operand.vmem [shape: bf16[128,128], index: 6, kind: input, shape index: {}]   ;;  %s2717_s5 = inlined_call_operand.vmem [shape: f32[1,128], index: 5, kind: input, shape index: {}]   ;;  %s2718_s9 = inlined_call_operand.vmem [shape: bf16[128,128], index: 9, kind: input, shape index: {}]   ;;  %s2719_s7 = inlined_call_operand.vmem [shape: f32[1,128], index: 7, kind: input, shape index: {}]   ;;  %s2720_s8 = inlined_call_operand.vmem [shape: bf16[8,128], index: 8, kind: input, shape index: {}]   ;;  %s2721_s10 = inlined_call_operand.vmem [shape: f32[1,128], index: 10, kind: input, shape index: {}]   ;;  %s2722_s11 = inlined_call_operand.vmem [shape: f32[8,128], index: 11, kind: output, shape index: {}]  }
   0x1   :  { %v1949_v0 = vld [vmem:[%s2711_s1 + $0x38] sm:$0xff]   ;;  %v1950_v1 = vld [vmem:[%s2711_s1 + $0x30] sm:$0xff]   ;;  %v1951_v2 = vld [vmem:[%s2711_s1 + $0x28] sm:$0xff]  }
   0x2   :  { %1715 = vmatprep.subr.bf16.mxu0 %v1949_v0  ;;  %v1952_v3 = vld [vmem:[%s2711_s1 + $0x20] sm:$0xff]   ;;  %v1953_v5 = vld [vmem:[%s2711_s1 + $0x18] sm:$0xff]   ;;  %v1954_v6 = vld [vmem:[%s2711_s1 + $0x10] sm:$0xff]  }
   0x3   :  { %1716 = vmatpush3.bf16.msra.mxu0 %v1949_v0  ;;  %v2181_v4 = vld [vmem:[%s2712_s0] sm:$0xff]   ;;  %v1965_v7 = vld [vmem:[%s2713_s2 + $0x38] sm:$0xff]   ;;  %v1966_v8 = vld [vmem:[%s2713_s2 + $0x30] sm:$0xff]  }
   0x4   :  { %1717 = vmatprep.subr.bf16.mxu0 %v1950_v1  ;;  %1731 = vmatprep.mubr.bf16.mxu0 %v2181_v4  ;;  %v1955_v9 = vld [vmem:[%s2711_s1 + $0x8] sm:$0xff]   ;;  %v1956_v11 = vld [vmem:[%s2711_s1] sm:$0xff]   ;;  %v1969_v13 = vld [vmem:[%s2713_s2 + $0x18] sm:$0xff]  }
   0x5   :  { %1747 = vmatprep.subr.bf16.mxu1 %v1965_v7  ;;  %v1967_v10 = vld [vmem:[%s2713_s2 + $0x28] sm:$0xff]   ;;  %v1968_v12 = vld [vmem:[%s2713_s2 + $0x20] sm:$0xff]   ;;  %v2219_v15 = vld [vmem:[%s2712_s0 + $0x10] sm:$0xff]  }
   0x6   :  { %1748 = vmatpush3.bf16.msra.mxu1 %v1965_v7  ;;  %v2214_v14 = vld [vmem:[%s2712_s0 + $0x8] sm:$0xff]   ;;  %v1970_v16 = vld [vmem:[%s2713_s2 + $0x10] sm:$0xff]   ;;  %v2229_v17 = vld [vmem:[%s2712_s0 + $0x18] sm:$0xff]  }
   0x7   :  { %1718 = vmatpush3.bf16.msra.mxu0 %v1950_v1  ;;  %1749 = vmatprep.subr.bf16.mxu1 %v1966_v8  ;;  %v2234_v18 = vld [vmem:[%s2712_s0 + $0x20] sm:$0xff]   ;;  %v2241_v19 = vld [vmem:[%s2712_s0 + $0x28] sm:$0xff]   ;;  %v2246_v20 = vld [vmem:[%s2712_s0 + $0x30] sm:$0xff]  }
   0x8   :  { %1719 = vmatprep.subr.bf16.mxu0 %v1951_v2  ;;  %v2253_v21 = vld [vmem:[%s2712_s0 + $0x38] sm:$0xff]   ;;  %v1971_v22 = vld [vmem:[%s2713_s2 + $0x8] sm:$0xff]   ;;  %v1972_v23 = vld [vmem:[%s2713_s2] sm:$0xff]  }
   0x9   :  { %v1973_v48 = vld [vmem:[%s2714_s4 + $0x38] sm:$0xff]   ;;  %v1974_v49 = vld [vmem:[%s2714_s4 + $0x30] sm:$0xff]   ;;  %v1975_v50 = vld [vmem:[%s2714_s4 + $0x28] sm:$0xff]  }
   0xa   :  { %1750 = vmatpush3.bf16.msra.mxu1 %v1966_v8  ;;  %v1976_v51 = vld [vmem:[%s2714_s4 + $0x20] sm:$0xff]   ;;  %v1977_v52 = vld [vmem:[%s2714_s4 + $0x18] sm:$0xff]   ;;  %v1978_v54 = vld [vmem:[%s2714_s4 + $0x10] sm:$0xff]  }
   0xb   :  { %1720 = vmatpush3.bf16.msra.mxu0 %v1951_v2  ;;  %1751 = vmatprep.subr.bf16.mxu1 %v1967_v10  ;;  %v1517_v1 = vld [vmem:[%s2715_s3] ss:$0 sm:$0xff] }
   0xc   :  { %1721 = vmatprep.subr.bf16.mxu0 %v1952_v3 }
   0xe   :  { %1752 = vmatpush3.bf16.msra.mxu1 %v1967_v10 }
   0xf   :  { %1722 = vmatpush3.bf16.msra.mxu0 %v1952_v3  ;;  %1753 = vmatprep.subr.bf16.mxu1 %v1968_v12 }
  0x10   :  { %1723 = vmatprep.subr.bf16.mxu0 %v1953_v5 }
  0x12   :  { %1754 = vmatpush3.bf16.msra.mxu1 %v1968_v12 }
  0x13   :  { %1724 = vmatpush3.bf16.msra.mxu0 %v1953_v5  ;;  %1755 = vmatprep.subr.bf16.mxu1 %v1969_v13 }
  0x14   :  { %1725 = vmatprep.subr.bf16.mxu0 %v1954_v6 }
  0x16   :  { %1756 = vmatpush3.bf16.msra.mxu1 %v1969_v13 }
  0x17   :  { %1726 = vmatpush3.bf16.msra.mxu0 %v1954_v6  ;;  %1757 = vmatprep.subr.bf16.mxu1 %v1970_v16 }
  0x18   :  { %1727 = vmatprep.subr.bf16.mxu0 %v1955_v9 }
  0x1a   :  { %1758 = vmatpush3.bf16.msra.mxu1 %v1970_v16 }
  0x1b   :  { %1728 = vmatpush3.bf16.msra.mxu0 %v1955_v9  ;;  %1759 = vmatprep.subr.bf16.mxu1 %v1971_v22 }
  0x1c   :  { %1729 = vmatprep.subr.bf16.mxu0 %v1956_v11 }
  0x1e   :  { %1760 = vmatpush3.bf16.msra.mxu1 %v1971_v22 }
  0x1f   :  { %1730 = vmatpush3.bf16.msra.mxu0 %v1956_v11  ;;  %1761 = vmatprep.subr.bf16.mxu1 %v1972_v23 }
  0x22   :  { %1732 = vmatmul.mubr.bf16.vlgmr.msra.gmra.mxu0 %v2214_v14  ;;  %1762 = vmatpush3.bf16.msra.mxu1 %v1972_v23 }
  0x23   :  { %1735 = vmatprep.mubr.bf16.mxu0 %v2219_v15  ;;  %1811 = vmatprep.subr.bf16.mxu1 %v1973_v48 }
  0x2a   :  { %1736 = vmatmul.mubr.bf16.gmra.mxu0 %v2229_v17 }
  0x2b   :  { %1739 = vmatprep.mubr.bf16.mxu0 %v2234_v18 }
  0x32   :  { %1740 = vmatmul.mubr.bf16.gmra.mxu0 %v2241_v19 }
  0x33   :  { %1743 = vmatprep.mubr.bf16.mxu0 %v2246_v20 }
  0x3a   :  { %1744 = vmatmul.mubr.bf16.gmra.mxu0 %v2253_v21 }
  0x3b   :  { %1795 = vmatprep.mubr.bf16.mxu0 %v2181_v4 }
  0xe2   :  { %v1733_v24 = vpop.f32.mrf.mxu0 }
  0xe4   :  { %v201_v25 = vpop.f32.mrf.mxu0 }
  0xe6   :  { %v1734_v26 = vpop.f32.mrf.mxu0 }
  0xe7   :  { %v265_v29 = vpack.c.bf16 %v1734_v26, %v1733_v24 }
  0xe8   :  { %v204_v27 = vpop.f32.mrf.mxu0 }
  0xe9   :  { %v264_v28 = vpack.c.bf16 %v204_v27, %v201_v25 }
  0xea   :  { %v1737_v30 = vpop.f32.mrf.mxu0 }
  0xeb   :  { %1763 = vmatprep.mubr.bf16.mxu1 %v264_v28 }
  0xec   :  { %v217_v31 = vpop.f32.mrf.mxu0  ;;  %1764 = vmatmul.mubr.bf16.vlgmr.msra.gmra.mxu1 %v265_v29 }
  0xed   :  { %1812 = vmatpush3.bf16.msra.mxu1 %v1973_v48 }
  0xee   :  { %v1738_v32 = vpop.f32.mrf.mxu0  ;;  %1813 = vmatprep.subr.bf16.mxu1 %v1974_v49 }
  0xef   :  { %v267_v35 = vpack.c.bf16 %v1738_v32, %v1737_v30 }
  0xf0   :  { %v220_v33 = vpop.f32.mrf.mxu0 }
  0xf1   :  { %v266_v34 = vpack.c.bf16 %v220_v33, %v217_v31  ;;  %1814 = vmatpush3.bf16.msra.mxu1 %v1974_v49 }
  0xf2   :  { %v1741_v36 = vpop.f32.mrf.mxu0  ;;  %1815 = vmatprep.subr.bf16.mxu1 %v1975_v50 }
  0xf3   :  { %1767 = vmatprep.mubr.bf16.mxu1 %v266_v34 }
  0xf4   :  { %v233_v37 = vpop.f32.mrf.mxu0  ;;  %1768 = vmatmul.mubr.bf16.gmra.mxu1 %v267_v35 }
  0xf5   :  { %1816 = vmatpush3.bf16.msra.mxu1 %v1975_v50 }
  0xf6   :  { %v1742_v38 = vpop.f32.mrf.mxu0  ;;  %1817 = vmatprep.subr.bf16.mxu1 %v1976_v51 }
  0xf7   :  { %v269_v41 = vpack.c.bf16 %v1742_v38, %v1741_v36 }
  0xf8   :  { %v236_v39 = vpop.f32.mrf.mxu0 }
  0xf9   :  { %v268_v40 = vpack.c.bf16 %v236_v39, %v233_v37  ;;  %1818 = vmatpush3.bf16.msra.mxu1 %v1976_v51 }
  0xfa   :  { %v1745_v42 = vpop.f32.mrf.mxu0  ;;  %1819 = vmatprep.subr.bf16.mxu1 %v1977_v52 }
  0xfb   :  { %1771 = vmatprep.mubr.bf16.mxu1 %v268_v40 }
  0xfc   :  { %v249_v43 = vpop.f32.mrf.mxu0  ;;  %1772 = vmatmul.mubr.bf16.gmra.mxu1 %v269_v41 }
  0xfd   :  { %1820 = vmatpush3.bf16.msra.mxu1 %v1977_v52 }
  0xfe   :  { %v1746_v44 = vpop.f32.mrf.mxu0  ;;  %1821 = vmatprep.subr.bf16.mxu1 %v1978_v54 }
  0xff   :  { %v271_v47 = vpack.c.bf16 %v1746_v44, %v1745_v42 }
 0x100   :  { %v252_v45 = vpop.f32.mrf.mxu0 }
 0x101   :  { %v270_v46 = vpack.c.bf16 %v252_v45, %v249_v43  ;;  %1822 = vmatpush3.bf16.msra.mxu1 %v1978_v54  ;;  %v536_v54 = vlaneseq }
 0x103   :  { %1775 = vmatprep.mubr.bf16.mxu1 %v270_v46 }
 0x104   :  { %1776 = vmatmul.mubr.bf16.gmra.mxu1 %v271_v47 }
 0x1ac   :  { %v1765_v53 = vpop.f32.mrf.mxu1 }
 0x1ad   :  { %v2320_v45 = vadd.f32 %v1765_v53, %v1517_v1 }
 0x1ae   :  { %v2281_v55 = vpop.f32.mrf.mxu1 }
 0x1af   :  { %v458_v52 = vmin.f32 %v2320_v45, 0.0  ;;  %vm442_vm14 = vcmp.gt.f32.partialorder %v2320_v45, 0.0 }
 0x1b0   :  { %v1766_v56 = vpop.f32.mrf.mxu1 }
 0x1b1   :  { %v2322_v46 = vadd.f32 %v1766_v56, %v1517_v1  ;;  %v2331_v56 = vadd.f32 %v1517_v1, %v2281_v55 }
 0x1b2   :  { %v380_v57 = vpop.f32.mrf.mxu1 }
 0x1b3   :  { %v2325_v49 = vadd.f32 %v1517_v1, %v380_v57  ;;  %vm443_vm13 = vcmp.gt.f32.partialorder %v2322_v46, 0.0 }
 0x1b4   :  { %v1769_v58 = vpop.f32.mrf.mxu1 }
 0x1b5   :  { %v2307_v30 = vadd.f32 %v1769_v58, %v1517_v1  ;;  %v459_v58 = vmin.f32 %v2322_v46, 0.0  ;;  %vm441_vm15 = vcmp.gt.f32.partialorder %v2325_v49, 0.0 }
 0x1b6   :  { %v393_v59 = vpop.f32.mrf.mxu1 }
 0x1b7   :  { %v462_v41 = vmin.f32 %v2307_v30, 0.0  ;;  %v2318_v42 = vadd.f32 %v1517_v1, %v393_v59  ;;  %v457_v59 = vmin.f32 %v2325_v49, 0.0  ;;  %vm446_vm10 = vcmp.gt.f32.partialorder %v2307_v30, 0.0 }
 0x1b8   :  { %v1770_v60 = vpop.f32.mrf.mxu1 }
 0x1b9   :  { %v2301_v23 = vadd.f32 %v1770_v60, %v1517_v1  ;;  %v484_v50 = vmul.f32 1.442695, %v462_v41  ;;  %v460_v51 = vmin.f32 %v2318_v42, 0.0  ;;  %vm444_vm12 = vcmp.gt.f32.partialorder %v2318_v42, 0.0 }
 0x1ba   :  { %v396_v61 = vpop.f32.mrf.mxu1 }
 0x1bb   :  { %v463_v36 = vmin.f32 %v2301_v23, 0.0  ;;  %v2314_v38 = vadd.f32 %v1517_v1, %v396_v61  ;;  %v480_v57 = vmul.f32 1.442695, %v460_v51  ;;  %v476_v61 = vmul.f32 1.442695, %v458_v52 }
 0x1bc   :  { %v1773_v62 = vpop.f32.mrf.mxu1  ;;  %vm447_vm9 = vcmp.gt.f32.partialorder %v2301_v23, 0.0 }
 0x1bd   :  { %v2288_v5 = vadd.f32 %v1773_v62, %v1517_v1  ;;  %v486_v47 = vmul.f32 1.442695, %v463_v36  ;;  %v461_v48 = vmin.f32 %v2314_v38, 0.0  ;;  %v2334_v62 = vand.u32 127, %v536_v54 }
 0x1be   :  { %v409_v63 = vpop.f32.mrf.mxu1  ;;  %vm445_vm11 = vcmp.gt.f32.partialorder %v2314_v38, 0.0 }
 0x1bf   :  { %v466_v11 = vmin.f32 %v2288_v5, 0.0  ;;  %v2299_v16 = vadd.f32 %v1517_v1, %v409_v63  ;;  %v482_v53 = vmul.f32 1.442695, %v461_v48  ;;  %vm538_vm1 = vcmp.eq.s32.totalorder %v2334_v62, 127  ;;  %v2100_v62 = vld [vmem:[%s2712_s0 + $0x20] sm:$0xff]  }
 0x1c0   :  { %v1774_v0 = vpop.f32.mrf.mxu1  ;;  %vm450_vm6 = vcmp.gt.f32.partialorder %v2288_v5, 0.0 }
 0x1c1   :  { %v2286_v2 = vadd.f32 %v1774_v0, %v1517_v1  ;;  %v492_v31 = vmul.f32 1.442695, %v466_v11  ;;  %v464_v33 = vmin.f32 %v2299_v16, 0.0  ;;  %v478_v0 = vmul.f32 1.442695, %v459_v58 }
 0x1c2   :  { %v412_v3 = vpop.f32.mrf.mxu1  ;;  %vm448_vm8 = vcmp.gt.f32.partialorder %v2299_v16, 0.0 }
 0x1c3   :  { %v2290_v7 = vadd.f32 %v1517_v1, %v412_v3  ;;  %v467_v9 = vmin.f32 %v2286_v2, 0.0  ;;  %v488_v43 = vmul.f32 1.442695, %v464_v33  ;;  %vm451_vm4 = vcmp.gt.f32.partialorder %v2286_v2, 0.0 }
 0x1c4   :  { %v1777_v6 = vpop.f32.mrf.mxu1 }
 0x1c5   :  { %v2292_v8 = vadd.f32 %v1777_v6, %v1517_v1  ;;  %v465_v24 = vmin.f32 %v2290_v7, 0.0  ;;  %v494_v27 = vmul.f32 1.442695, %v467_v9  ;;  %v456_v9 = vmin.f32 %v2331_v56, 0.0 }
 0x1c6   :  { %v425_v10 = vpop.f32.mrf.mxu1  ;;  %vm449_vm7 = vcmp.gt.f32.partialorder %v2290_v7, 0.0 }
 0x1c7   :  { %v470_v12 = vmin.f32 %v2292_v8, 0.0  ;;  %v2297_v13 = vadd.f32 %v1517_v1, %v425_v10  ;;  %v490_v37 = vmul.f32 1.442695, %v465_v24  ;;  %v474_v10 = vmul.f32 1.442695, %v457_v59 }
 0x1c8   :  { %v1778_v22 = vpop.f32.mrf.mxu1  ;;  %vm454_vm0 = vcmp.gt.f32.partialorder %v2292_v8, 0.0 }
 0x1c9   :  { %v500_v25 = vmul.f32 1.442695, %v470_v12  ;;  %v468_v26 = vmin.f32 %v2297_v13, 0.0  ;;  %v2305_v28 = vadd.f32 %v1778_v22, %v1517_v1  ;;  %vm452_vm2 = vcmp.gt.f32.partialorder %v2297_v13, 0.0 }
 0x1ca   :  { %v428_v29 = vpop.f32.mrf.mxu1 }
 0x1cb   :  { %1997 = vpow2.f32 %v500_v25  ;;  %v496_v32 = vmul.f32 1.442695, %v468_v26  ;;  %v471_v34 = vmin.f32 %v2305_v28, 0.0  ;;  %v2311_v35 = vadd.f32 %v1517_v1, %v428_v29 }
 0x1cc   :  { %vm455_vm3 = vcmp.gt.f32.partialorder %v2305_v28, 0.0 }
 0x1cd   :  { %1999 = vpow2.f32 %v496_v32  ;;  %v502_v39 = vmul.f32 1.442695, %v471_v34  ;;  %v469_v40 = vmin.f32 %v2311_v35, 0.0  ;;  %vm453_vm5 = vcmp.gt.f32.partialorder %v2311_v35, 0.0 }
 0x1ce   :  { %2001 = vpow2.f32 %v494_v27  ;;  %v472_v27 = vmul.f32 1.442695, %v456_v9 }
 0x1cf   :  { %2003 = vpow2.f32 %v492_v31  ;;  %v498_v44 = vmul.f32 1.442695, %v469_v40 }
 0x1d0   :  { %2005 = vpow2.f32 %v502_v39 }
 0x1d1   :  { %2007 = vpow2.f32 %v490_v37 }
 0x1d2   :  { %2009 = vpow2.f32 %v498_v44 }
 0x1d3   :  { %2011 = vpow2.f32 %v488_v43 }
 0x1d4   :  { %2013 = vpow2.f32 %v486_v47 }
 0x1d5   :  { %2015 = vpow2.f32 %v484_v50 }
 0x1d6   :  { %2017 = vpow2.f32 %v482_v53 }
 0x1d7   :  { %2019 = vpow2.f32 %v480_v57 }
 0x1d8   :  { %v1998_v60 = vpop.eup %1997  ;;  %2021 = vpow2.f32 %v476_v61 }
 0x1d9   :  { %v1540_v3 = vadd.f32 -1.0, %v1998_v60  ;;  %2023 = vpow2.f32 %v478_v0 }
 0x1da   :  { %v2000_v63 = vpop.eup %1999  ;;  %2025 = vpow2.f32 %v474_v10 }
 0x1db   :  { %v2002_v6 = vpop.eup %2001  ;;  %v1538_v55 = vadd.f32 -1.0, %v2000_v63  ;;  %v534_v24 = vsel %vm454_vm0, %v2292_v8, %v1540_v3  ;;  %2027 = vpow2.f32 %v472_v27  ;;  %vm440_vm0 = vcmp.gt.f32.partialorder %v2331_v56, 0.0 }
 0x1dc   :  { %v2004_v11 = vpop.eup %2003  ;;  %v1537_v22 = vadd.f32 -1.0, %v2002_v6  ;;  %v553_v8 = vsel %vm538_vm1, 1.0, %v534_v24 }
 0x1dd   :  { %v2006_v1 = vpop.eup %2005  ;;  %v1536_v29 = vadd.f32 -1.0, %v2004_v11  ;;  %v532_v31 = vsel %vm452_vm2, %v2297_v13, %v1538_v55 }
 0x1de   :  { %v2008_v12 = vpop.eup %2007  ;;  %v1541_v25 = vadd.f32 -1.0, %v2006_v1  ;;  %v531_v37 = vsel %vm451_vm4, %v2286_v2, %v1537_v22 }
 0x1df   :  { %v2010_v26 = vpop.eup %2009  ;;  %v1535_v39 = vadd.f32 -1.0, %v2008_v12  ;;  %v530_v44 = vsel %vm450_vm6, %v2288_v5, %v1536_v29 }
 0x1e0   :  { %v535_v32 = vsel %vm455_vm3, %v2305_v28, %v1541_v25  ;;  %v1539_v33 = vadd.f32 -1.0, %v2010_v26  ;;  %v2012_v34 = vpop.eup %2011  ;;  %v551_v28 = vsel %vm538_vm1, 1.0, %v532_v31  ;;  %v549_v5 = vsel %vm538_vm1, 1.0, %v530_v44 }
 0x1e1   :  { %v554_v36 = vsel %vm538_vm1, 1.0, %v535_v32  ;;  %v2014_v41 = vpop.eup %2013  ;;  %v1534_v47 = vadd.f32 -1.0, %v2012_v34  ;;  %v529_v51 = vsel %vm449_vm7, %v2290_v7, %v1535_v39 }
 0x1e2   :  { %v533_v40 = vsel %vm453_vm5, %v2311_v35, %v1539_v33  ;;  %v562_v13 = vpack.c.bf16 %v554_v36, %v553_v8  ;;  %v2016_v2 = vpop.eup %2015  ;;  %v550_v35 = vsel %vm538_vm1, 1.0, %v531_v37  ;;  %v1533_v50 = vadd.f32 -1.0, %v2014_v41 }
 0x1e3   :  { %v552_v43 = vsel %vm538_vm1, 1.0, %v533_v40  ;;  %v2018_v52 = vpop.eup %2017  ;;  %v1532_v54 = vadd.f32 -1.0, %v2016_v2  ;;  %v528_v58 = vsel %vm448_vm8, %v2299_v16, %v1534_v47  ;;  %v560_v53 = vpack.c.bf16 %v550_v35, %v549_v5 }
 0x1e4   :  { %1779 = vmatprep.subr.bf16.mxu0 %v562_v13  ;;  %v561_v48 = vpack.c.bf16 %v552_v43, %v551_v28  ;;  %v2020_v59 = vpop.eup %2019  ;;  %v548_v60 = vsel %vm538_vm1, 1.0, %v529_v51  ;;  %v527_v7 = vsel %vm447_vm9, %v2301_v23, %v1533_v50  ;;  %v1531_v61 = vadd.f32 -1.0, %v2018_v52 }
 0x1e5   :  { %1780 = vmatpush3.bf16.msra.mxu0 %v562_v13  ;;  %v2022_v57 = vpop.eup %2021  ;;  %v547_v0 = vsel %vm538_vm1, 1.0, %v528_v58  ;;  %v526_v3 = vsel %vm446_vm10, %v2307_v30, %v1532_v54  ;;  %v1530_v6 = vadd.f32 -1.0, %v2020_v59  ;;  %v546_v10 = vsel %vm538_vm1, 1.0, %v527_v7  ;;  %v1981_v54 = vld [vmem:[%s2716_s6 + $0x38] sm:$0xff]   ;;  %v1982_v58 = vld [vmem:[%s2716_s6 + $0x30] sm:$0xff]   ;;  %v1984_v59 = vld [vmem:[%s2716_s6 + $0x20] sm:$0xff]  }
 0x1e6   :  { %1781 = vmatprep.subr.bf16.mxu0 %v561_v48  ;;  %v2024_v63 = vpop.eup %2023  ;;  %v559_v9 = vpack.c.bf16 %v548_v60, %v547_v0  ;;  %v525_v11 = vsel %vm445_vm11, %v2314_v38, %v1531_v61  ;;  %v545_v55 = vsel %vm538_vm1, 1.0, %v526_v3  ;;  %v1528_v1 = vadd.f32 -1.0, %v2022_v57  ;;  %v1985_v60 = vld [vmem:[%s2716_s6 + $0x18] sm:$0xff]   ;;  %v1986_v7 = vld [vmem:[%s2716_s6 + $0x10] sm:$0xff]  }
 0x1e7   :  { %v2026_v16 = vpop.eup %2025  ;;  %v1529_v23 = vadd.f32 -1.0, %v2024_v63  ;;  %v524_v30 = vsel %vm444_vm12, %v2318_v42, %v1530_v6  ;;  %v558_v12 = vpack.c.bf16 %v546_v10, %v545_v55  ;;  %v544_v24 = vsel %vm538_vm1, 1.0, %v525_v11  ;;  %v1542_v55 = vld [vmem:[%s2717_s5] ss:$0 sm:$0xff] }
 0x1e8   :  { %v2028_v22 = vpop.eup %2027  ;;  %v1527_v38 = vadd.f32 -1.0, %v2026_v16  ;;  %v543_v26 = vsel %vm538_vm1, 1.0, %v524_v30  ;;  %v522_v27 = vsel %vm442_vm14, %v2320_v45, %v1528_v1 }
 0x1e9   :  { %1782 = vmatpush3.bf16.msra.mxu0 %v561_v48  ;;  %v523_v25 = vsel %vm443_vm13, %v2322_v46, %v1529_v23  ;;  %v1526_v42 = vadd.f32 -1.0, %v2028_v22  ;;  %v557_v29 = vpack.c.bf16 %v544_v24, %v543_v26  ;;  %v541_v46 = vsel %vm538_vm1, 1.0, %v522_v27 }
 0x1ea   :  { %1783 = vmatprep.subr.bf16.mxu0 %v560_v53  ;;  %v542_v31 = vsel %vm538_vm1, 1.0, %v523_v25  ;;  %v521_v32 = vsel %vm441_vm15, %v2325_v49, %v1527_v38  ;;  %v1979_v49 = vld [vmem:[%s2714_s4 + $0x8] sm:$0xff]  }
 0x1eb   :  { %v520_v33 = vsel %vm440_vm0, %v2331_v56, %v1526_v42  ;;  %v556_v34 = vpack.c.bf16 %v542_v31, %v541_v46  ;;  %v540_v45 = vsel %vm538_vm1, 1.0, %v521_v32  ;;  %1823 = vmatprep.subr.bf16.mxu1 %v1979_v49 }
 0x1ec   :  { %v539_v8 = vsel %vm538_vm1, 1.0, %v520_v33  ;;  %1824 = vmatpush3.bf16.msra.mxu1 %v1979_v49 }
 0x1ed   :  { %1784 = vmatpush3.bf16.msra.mxu0 %v560_v53  ;;  %v555_v36 = vpack.c.bf16 %v540_v45, %v539_v8  ;;  %v1983_v53 = vld [vmem:[%s2716_s6 + $0x28] sm:$0xff]  }
 0x1ee   :  { %1785 = vmatprep.subr.bf16.mxu0 %v559_v9 }
 0x1f1   :  { %1786 = vmatpush3.bf16.msra.mxu0 %v559_v9 }
 0x1f2   :  { %1787 = vmatprep.subr.bf16.mxu0 %v558_v12 }
 0x1f5   :  { %1788 = vmatpush3.bf16.msra.mxu0 %v558_v12 }
 0x1f6   :  { %1789 = vmatprep.subr.bf16.mxu0 %v557_v29 }
 0x1f9   :  { %1790 = vmatpush3.bf16.msra.mxu0 %v557_v29 }
 0x1fa   :  { %1791 = vmatprep.subr.bf16.mxu0 %v556_v34 }
 0x1fd   :  { %1792 = vmatpush3.bf16.msra.mxu0 %v556_v34 }
 0x1fe   :  { %1793 = vmatprep.subr.bf16.mxu0 %v555_v36 }
 0x201   :  { %1794 = vmatpush3.bf16.msra.mxu0 %v555_v36 }
 0x204   :  { %1796 = vmatmul.mubr.bf16.vlgmr.msra.gmra.mxu0 %v2214_v14  ;;  %v1980_v14 = vld [vmem:[%s2714_s4] sm:$0xff]  }
 0x205   :  { %1799 = vmatprep.mubr.bf16.mxu0 %v2219_v15  ;;  %1825 = vmatprep.subr.bf16.mxu1 %v1980_v14 }
 0x206   :  { %1826 = vmatpush3.bf16.msra.mxu1 %v1980_v14 }
 0x207   :  { %1875 = vmatprep.subr.bf16.mxu1 %v1981_v54 }
 0x20c   :  { %1800 = vmatmul.mubr.bf16.gmra.mxu0 %v2229_v17 }
 0x20d   :  { %1803 = vmatprep.mubr.bf16.mxu0 %v2234_v18 }
 0x214   :  { %1804 = vmatmul.mubr.bf16.gmra.mxu0 %v2241_v19 }
 0x215   :  { %1807 = vmatprep.mubr.bf16.mxu0 %v2246_v20 }
 0x21c   :  { %1808 = vmatmul.mubr.bf16.gmra.mxu0 %v2253_v21 }
 0x21d   :  { %1859 = vmatprep.mubr.bf16.mxu0 %v2181_v4 }
 0x2c4   :  { %v1797_v15 = vpop.f32.mrf.mxu0 }
 0x2c6   :  { %v597_v17 = vpop.f32.mrf.mxu0 }
 0x2c8   :  { %v1798_v18 = vpop.f32.mrf.mxu0 }
 0x2c9   :  { %v661_v21 = vpack.c.bf16 %v1798_v18, %v1797_v15 }
 0x2ca   :  { %v600_v19 = vpop.f32.mrf.mxu0 }
 0x2cb   :  { %v660_v20 = vpack.c.bf16 %v600_v19, %v597_v17 }
 0x2cc   :  { %v1801_v56 = vpop.f32.mrf.mxu0 }
 0x2cd   :  { %1827 = vmatprep.mubr.bf16.mxu1 %v660_v20 }
 0x2ce   :  { %v613_v4 = vpop.f32.mrf.mxu0  ;;  %1828 = vmatmul.mubr.bf16.vlgmr.msra.gmra.mxu1 %v661_v21 }
 0x2cf   :  { %1876 = vmatpush3.bf16.msra.mxu1 %v1981_v54 }
 0x2d0   :  { %v1802_v37 = vpop.f32.mrf.mxu0  ;;  %1877 = vmatprep.subr.bf16.mxu1 %v1982_v58 }
 0x2d1   :  { %v663_v13 = vpack.c.bf16 %v1802_v37, %v1801_v56 }
 0x2d2   :  { %v616_v39 = vpop.f32.mrf.mxu0 }
 0x2d3   :  { %v662_v40 = vpack.c.bf16 %v616_v39, %v613_v4  ;;  %1878 = vmatpush3.bf16.msra.mxu1 %v1982_v58 }
 0x2d4   :  { %v1805_v41 = vpop.f32.mrf.mxu0  ;;  %1879 = vmatprep.subr.bf16.mxu1 %v1983_v53 }
 0x2d5   :  { %1831 = vmatprep.mubr.bf16.mxu1 %v662_v40 }
 0x2d6   :  { %v629_v28 = vpop.f32.mrf.mxu0  ;;  %1832 = vmatmul.mubr.bf16.gmra.mxu1 %v663_v13 }
 0x2d7   :  { %1880 = vmatpush3.bf16.msra.mxu1 %v1983_v53 }
 0x2d8   :  { %v1806_v43 = vpop.f32.mrf.mxu0  ;;  %1881 = vmatprep.subr.bf16.mxu1 %v1984_v59 }
 0x2d9   :  { %v665_v48 = vpack.c.bf16 %v1806_v43, %v1805_v41 }
 0x2da   :  { %v632_v44 = vpop.f32.mrf.mxu0 }
 0x2db   :  { %v664_v47 = vpack.c.bf16 %v632_v44, %v629_v28  ;;  %1882 = vmatpush3.bf16.msra.mxu1 %v1984_v59 }
 0x2dc   :  { %v1809_v2 = vpop.f32.mrf.mxu0  ;;  %1883 = vmatprep.subr.bf16.mxu1 %v1985_v60 }
 0x2dd   :  { %1835 = vmatprep.mubr.bf16.mxu1 %v664_v47 }
 0x2de   :  { %v645_v35 = vpop.f32.mrf.mxu0  ;;  %1836 = vmatmul.mubr.bf16.gmra.mxu1 %v665_v48 }
 0x2df   :  { %1884 = vmatpush3.bf16.msra.mxu1 %v1985_v60 }
 0x2e0   :  { %v1810_v50 = vpop.f32.mrf.mxu0  ;;  %1885 = vmatprep.subr.bf16.mxu1 %v1986_v7 }
 0x2e1   :  { %v667_v5 = vpack.c.bf16 %v1810_v50, %v1809_v2 }
 0x2e2   :  { %v648_v51 = vpop.f32.mrf.mxu0 }
 0x2e3   :  { %v666_v52 = vpack.c.bf16 %v648_v51, %v645_v35  ;;  %1886 = vmatpush3.bf16.msra.mxu1 %v1986_v7 }
 0x2e5   :  { %1839 = vmatprep.mubr.bf16.mxu1 %v666_v52 }
 0x2e6   :  { %1840 = vmatmul.mubr.bf16.gmra.mxu1 %v667_v5 }
 0x38e   :  { %v1829_v57 = vpop.f32.mrf.mxu1 }
 0x38f   :  { %v2473_v43 = vadd.f32 %v1829_v57, %v1542_v55 }
 0x390   :  { %v2434_v61 = vpop.f32.mrf.mxu1 }
 0x391   :  { %v854_v51 = vmin.f32 %v2473_v43, 0.0  ;;  %v2484_v54 = vadd.f32 %v1542_v55, %v2434_v61  ;;  %vm838_vm15 = vcmp.gt.f32.partialorder %v2473_v43, 0.0 }
 0x392   :  { %v1830_v63 = vpop.f32.mrf.mxu1 }
 0x393   :  { %v2475_v44 = vadd.f32 %v1830_v63, %v1542_v55  ;;  %v872_v60 = vmul.f32 1.442695, %v854_v51 }
 0x394   :  { %v776_v0 = vpop.f32.mrf.mxu1 }
 0x395   :  { %v2478_v2 = vadd.f32 %v1542_v55, %v776_v0  ;;  %v855_v52 = vmin.f32 %v2475_v44, 0.0  ;;  %vm839_vm14 = vcmp.gt.f32.partialorder %v2475_v44, 0.0 }
 0x396   :  { %v1833_v16 = vpop.f32.mrf.mxu1 }
 0x397   :  { %v2460_v14 = vadd.f32 %v1833_v16, %v1542_v55  ;;  %v853_v58 = vmin.f32 %v2478_v2, 0.0  ;;  %v874_v7 = vmul.f32 1.442695, %v855_v52  ;;  %v852_v16 = vmin.f32 %v2484_v54, 0.0 }
 0x398   :  { %v789_v3 = vpop.f32.mrf.mxu1  ;;  %vm837_vm0 = vcmp.gt.f32.partialorder %v2478_v2, 0.0 }
 0x399   :  { %v858_v40 = vmin.f32 %v2460_v14, 0.0  ;;  %v2471_v13 = vadd.f32 %v1542_v55, %v789_v3  ;;  %v870_v3 = vmul.f32 1.442695, %v853_v58  ;;  %vm842_vm11 = vcmp.gt.f32.partialorder %v2460_v14, 0.0 }
 0x39a   :  { %v1834_v6 = vpop.f32.mrf.mxu1 }
 0x39b   :  { %v2454_v46 = vadd.f32 %v1834_v6, %v1542_v55  ;;  %v880_v35 = vmul.f32 1.442695, %v858_v40  ;;  %v856_v50 = vmin.f32 %v2471_v13, 0.0  ;;  %vm840_vm13 = vcmp.gt.f32.partialorder %v2471_v13, 0.0 }
 0x39c   :  { %v792_v9 = vpop.f32.mrf.mxu1 }
 0x39d   :  { %v859_v21 = vmin.f32 %v2454_v46, 0.0  ;;  %v2467_v4 = vadd.f32 %v1542_v55, %v792_v9  ;;  %v876_v59 = vmul.f32 1.442695, %v856_v50  ;;  %vm843_vm10 = vcmp.gt.f32.partialorder %v2454_v46, 0.0 }
 0x39e   :  { %v1837_v10 = vpop.f32.mrf.mxu1 }
 0x39f   :  { %v2441_v12 = vadd.f32 %v1837_v10, %v1542_v55  ;;  %v882_v47 = vmul.f32 1.442695, %v859_v21  ;;  %v857_v48 = vmin.f32 %v2467_v4, 0.0  ;;  %vm841_vm12 = vcmp.gt.f32.partialorder %v2467_v4, 0.0 }
 0x3a0   :  { %v805_v23 = vpop.f32.mrf.mxu1 }
 0x3a1   :  { %v862_v27 = vmin.f32 %v2441_v12, 0.0  ;;  %v2452_v31 = vadd.f32 %v1542_v55, %v805_v23  ;;  %v878_v5 = vmul.f32 1.442695, %v857_v48  ;;  %vm846_vm7 = vcmp.gt.f32.partialorder %v2441_v12, 0.0 }
 0x3a2   :  { %v1838_v11 = vpop.f32.mrf.mxu1 }
 0x3a3   :  { %v2439_v1 = vadd.f32 %v1838_v11, %v1542_v55  ;;  %v888_v15 = vmul.f32 1.442695, %v862_v27  ;;  %v860_v18 = vmin.f32 %v2452_v31, 0.0  ;;  %vm844_vm9 = vcmp.gt.f32.partialorder %v2452_v31, 0.0 }
 0x3a4   :  { %v808_v30 = vpop.f32.mrf.mxu1 }
 0x3a5   :  { %v2443_v24 = vadd.f32 %v1542_v55, %v808_v30  ;;  %v863_v38 = vmin.f32 %v2439_v1, 0.0  ;;  %v884_v41 = vmul.f32 1.442695, %v860_v18  ;;  %vm847_vm5 = vcmp.gt.f32.partialorder %v2439_v1, 0.0 }
 0x3a6   :  { %v1841_v22 = vpop.f32.mrf.mxu1 }
 0x3a7   :  { %v2445_v25 = vadd.f32 %v1841_v22, %v1542_v55  ;;  %v861_v33 = vmin.f32 %v2443_v24, 0.0  ;;  %v890_v8 = vmul.f32 1.442695, %v863_v38  ;;  %v868_v22 = vmul.f32 1.442695, %v852_v16 }
 0x3a8   :  { %v821_v26 = vpop.f32.mrf.mxu1  ;;  %vm845_vm8 = vcmp.gt.f32.partialorder %v2443_v24, 0.0 }
 0x3a9   :  { %v866_v42 = vmin.f32 %v2445_v25, 0.0  ;;  %v2450_v29 = vadd.f32 %v1542_v55, %v821_v26  ;;  %v886_v56 = vmul.f32 1.442695, %v861_v33  ;;  %vm850_vm2 = vcmp.gt.f32.partialorder %v2445_v25, 0.0 }
 0x3aa   :  { %v1842_v32 = vpop.f32.mrf.mxu1 }
 0x3ab   :  { %v896_v34 = vmul.f32 1.442695, %v866_v42  ;;  %v864_v45 = vmin.f32 %v2450_v29, 0.0  ;;  %v2458_v36 = vadd.f32 %v1842_v32, %v1542_v55  ;;  %vm848_vm3 = vcmp.gt.f32.partialorder %v2450_v29, 0.0 }
 0x3ac   :  { %v824_v49 = vpop.f32.mrf.mxu1 }
 0x3ad   :  { %2029 = vpow2.f32 %v896_v34  ;;  %v892_v17 = vmul.f32 1.442695, %v864_v45  ;;  %v867_v19 = vmin.f32 %v2458_v36, 0.0  ;;  %v2464_v20 = vadd.f32 %v1542_v55, %v824_v49 }
 0x3ae   :  { %vm851_vm4 = vcmp.gt.f32.partialorder %v2458_v36, 0.0 }
 0x3af   :  { %2031 = vpow2.f32 %v892_v17  ;;  %v898_v37 = vmul.f32 1.442695, %v867_v19  ;;  %v865_v39 = vmin.f32 %v2464_v20, 0.0  ;;  %vm849_vm6 = vcmp.gt.f32.partialorder %v2464_v20, 0.0 }
 0x3b0   :  { %2033 = vpow2.f32 %v890_v8 }
 0x3b1   :  { %2035 = vpow2.f32 %v888_v15  ;;  %v894_v28 = vmul.f32 1.442695, %v865_v39 }
 0x3b2   :  { %2037 = vpow2.f32 %v898_v37 }
 0x3b3   :  { %2039 = vpow2.f32 %v886_v56 }
 0x3b4   :  { %2041 = vpow2.f32 %v894_v28 }
 0x3b5   :  { %2043 = vpow2.f32 %v884_v41 }
 0x3b6   :  { %2045 = vpow2.f32 %v882_v47 }
 0x3b7   :  { %2047 = vpow2.f32 %v880_v35 }
 0x3b8   :  { %2049 = vpow2.f32 %v878_v5 }
 0x3b9   :  { %2051 = vpow2.f32 %v876_v59 }
 0x3ba   :  { %v2030_v53 = vpop.eup %2029  ;;  %2053 = vpow2.f32 %v872_v60 }
 0x3bb   :  { %v1565_v63 = vadd.f32 -1.0, %v2030_v53  ;;  %2055 = vpow2.f32 %v874_v7 }
 0x3bc   :  { %v2032_v57 = vpop.eup %2031  ;;  %2057 = vpow2.f32 %v870_v3 }
 0x3bd   :  { %v2034_v0 = vpop.eup %2033  ;;  %v1563_v9 = vadd.f32 -1.0, %v2032_v57  ;;  %v930_v11 = vsel %vm850_vm2, %v2445_v25, %v1565_v63  ;;  %2059 = vpow2.f32 %v868_v22  ;;  %vm836_vm2 = vcmp.gt.f32.partialorder %v2484_v54, 0.0  ;;  %v2099_v22 = vld [vmem:[%s2712_s0 + $0x18] sm:$0xff]  }
 0x3be   :  { %v2036_v6 = vpop.eup %2035  ;;  %v1562_v23 = vadd.f32 -1.0, %v2034_v0  ;;  %v946_v25 = vsel %vm538_vm1, 1.0, %v930_v11 }
 0x3bf   :  { %v2038_v10 = vpop.eup %2037  ;;  %v1561_v38 = vadd.f32 -1.0, %v2036_v6  ;;  %v928_v26 = vsel %vm848_vm3, %v2450_v29, %v1563_v9 }
 0x3c0   :  { %v2040_v61 = vpop.eup %2039  ;;  %v1566_v55 = vadd.f32 -1.0, %v2038_v10  ;;  %v927_v34 = vsel %vm847_vm5, %v2439_v1, %v1562_v23 }
 0x3c1   :  { %v2042_v30 = vpop.eup %2041  ;;  %v1560_v45 = vadd.f32 -1.0, %v2040_v61  ;;  %v926_v17 = vsel %vm846_vm7, %v2441_v12, %v1561_v38  ;;  %v2101_v38 = vld [vmem:[%s2712_s0 + $0x28] sm:$0xff]  }
 0x3c2   :  { %v931_v27 = vsel %vm851_vm4, %v2458_v36, %v1566_v55  ;;  %v1564_v42 = vadd.f32 -1.0, %v2042_v30  ;;  %v2044_v32 = vpop.eup %2043  ;;  %v944_v36 = vsel %vm538_vm1, 1.0, %v928_v26  ;;  %v942_v12 = vsel %vm538_vm1, 1.0, %v926_v17  ;;  %v2102_v26 = vld [vmem:[%s2712_s0 + $0x30] sm:$0xff]  }
 0x3c3   :  { %v947_v33 = vsel %vm538_vm1, 1.0, %v931_v27  ;;  %v2046_v49 = vpop.eup %2045  ;;  %v1559_v18 = vadd.f32 -1.0, %v2044_v32  ;;  %v925_v56 = vsel %vm845_vm8, %v2443_v24, %v1560_v45  ;;  %v2103_v27 = vld [vmem:[%s2712_s0 + $0x38] sm:$0xff]   ;;  %v1988_v32 = vld [vmem:[%s2716_s6] sm:$0xff]  }
 0x3c4   :  { %v929_v8 = vsel %vm849_vm6, %v2464_v20, %v1564_v42  ;;  %v955_v29 = vpack.c.bf16 %v947_v33, %v946_v25  ;;  %v2048_v1 = vpop.eup %2047  ;;  %v943_v20 = vsel %vm538_vm1, 1.0, %v927_v34  ;;  %v1558_v21 = vadd.f32 -1.0, %v2046_v49  ;;  %v1987_v42 = vld [vmem:[%s2716_s6 + $0x8] sm:$0xff]  }
 0x3c5   :  { %v945_v15 = vsel %vm538_vm1, 1.0, %v929_v8  ;;  %v2050_v37 = vpop.eup %2049  ;;  %v1557_v39 = vadd.f32 -1.0, %v2048_v1  ;;  %v924_v40 = vsel %vm844_vm9, %v2452_v31, %v1559_v18  ;;  %v953_v41 = vpack.c.bf16 %v943_v20, %v942_v12  ;;  %1887 = vmatprep.subr.bf16.mxu1 %v1987_v42 }
 0x3c6   :  { %1843 = vmatprep.subr.bf16.mxu0 %v955_v29  ;;  %v954_v19 = vpack.c.bf16 %v945_v15, %v944_v36  ;;  %v2052_v28 = vpop.eup %2051  ;;  %v941_v47 = vsel %vm538_vm1, 1.0, %v925_v56  ;;  %v923_v24 = vsel %vm843_vm10, %v2454_v46, %v1558_v21  ;;  %v1556_v35 = vadd.f32 -1.0, %v2050_v37  ;;  %1888 = vmatpush3.bf16.msra.mxu1 %v1987_v42 }
 0x3c7   :  { %1844 = vmatpush3.bf16.msra.mxu0 %v955_v29  ;;  %v2054_v48 = vpop.eup %2053  ;;  %v940_v51 = vsel %vm538_vm1, 1.0, %v924_v40  ;;  %v922_v52 = vsel %vm842_vm11, %v2460_v14, %v1557_v39  ;;  %v1555_v5 = vadd.f32 -1.0, %v2052_v28  ;;  %v939_v53 = vsel %vm538_vm1, 1.0, %v923_v24  ;;  %1889 = vmatprep.subr.bf16.mxu1 %v1988_v32 }
 0x3c8   :  { %1845 = vmatprep.subr.bf16.mxu0 %v954_v19  ;;  %v2056_v50 = vpop.eup %2055  ;;  %v952_v58 = vpack.c.bf16 %v941_v47, %v940_v51  ;;  %v921_v59 = vsel %vm841_vm12, %v2467_v4, %v1556_v35  ;;  %v938_v60 = vsel %vm538_vm1, 1.0, %v922_v52  ;;  %v1553_v57 = vadd.f32 -1.0, %v2054_v48  ;;  %v1989_v35 = vld [vmem:[%s2718_s9 + $0x38] sm:$0xff]   ;;  %v1991_v51 = vld [vmem:[%s2718_s9 + $0x28] sm:$0xff]  }
 0x3c9   :  { %v2058_v31 = vpop.eup %2057  ;;  %v1554_v46 = vadd.f32 -1.0, %v2056_v50  ;;  %v920_v14 = vsel %vm840_vm13, %v2471_v13, %v1555_v5  ;;  %v951_v7 = vpack.c.bf16 %v939_v53, %v938_v60  ;;  %v937_v0 = vsel %vm538_vm1, 1.0, %v921_v59  ;;  %v1990_v50 = vld [vmem:[%s2718_s9 + $0x30] sm:$0xff]   ;;  %v1993_v52 = vld [vmem:[%s2718_s9 + $0x18] sm:$0xff]  }
 0x3ca   :  { %v2060_v63 = vpop.eup %2059  ;;  %v1552_v4 = vadd.f32 -1.0, %v2058_v31  ;;  %v936_v3 = vsel %vm538_vm1, 1.0, %v920_v14  ;;  %v918_v6 = vsel %vm838_vm15, %v2473_v43, %v1553_v57  ;;  %1890 = vmatpush3.bf16.msra.mxu1 %v1988_v32  ;;  %v2104_v24 = vmov 0.0   ;;  %v1992_v31 = vld [vmem:[%s2718_s9 + $0x20] sm:$0xff]   ;;  %v1994_v5 = vld [vmem:[%s2718_s9 + $0x10] sm:$0xff]  }
 0x3cb   :  { %1846 = vmatpush3.bf16.msra.mxu0 %v954_v19  ;;  %v919_v16 = vsel %vm839_vm14, %v2475_v44, %v1554_v46  ;;  %v1551_v13 = vadd.f32 -1.0, %v2060_v63  ;;  %v950_v9 = vpack.c.bf16 %v937_v0, %v936_v3  ;;  %v934_v44 = vsel %vm538_vm1, 1.0, %v918_v6  ;;  %1927 = vmatprep.subr.bf16.mxu1 %v2104_v24  ;;  %v1567_v6 = vld [vmem:[%s2719_s7] ss:$0 sm:$0xff] }
 0x3cc   :  { %1847 = vmatprep.subr.bf16.mxu0 %v953_v41  ;;  %v935_v10 = vsel %vm538_vm1, 1.0, %v919_v16  ;;  %v917_v61 = vsel %vm837_vm0, %v2478_v2, %v1552_v4  ;;  %v2097_v2 = vld [vmem:[%s2712_s0 + $0x8] sm:$0xff]  }
 0x3cd   :  { %v916_v23 = vsel %vm836_vm2, %v2484_v54, %v1551_v13  ;;  %v949_v11 = vpack.c.bf16 %v935_v10, %v934_v44  ;;  %v933_v43 = vsel %vm538_vm1, 1.0, %v917_v61  ;;  %v2098_v54 = vld [vmem:[%s2712_s0 + $0x10] sm:$0xff]  }
 0x3ce   :  { %v932_v55 = vsel %vm538_vm1, 1.0, %v916_v23  ;;  %vm2105_vm1 = vmmov 0  }
 0x3cf   :  { %1848 = vmatpush3.bf16.msra.mxu0 %v953_v41  ;;  %v948_v30 = vpack.c.bf16 %v933_v43, %v932_v55 }
 0x3d0   :  { %1849 = vmatprep.subr.bf16.mxu0 %v952_v58 }
 0x3d3   :  { %1850 = vmatpush3.bf16.msra.mxu0 %v952_v58  ;;  %v1995_v58 = vld [vmem:[%s2718_s9 + $0x8] sm:$0xff]  }
 0x3d4   :  { %1851 = vmatprep.subr.bf16.mxu0 %v951_v7 }
 0x3d7   :  { %1852 = vmatpush3.bf16.msra.mxu0 %v951_v7 }
 0x3d8   :  { %1853 = vmatprep.subr.bf16.mxu0 %v950_v9 }
 0x3db   :  { %1854 = vmatpush3.bf16.msra.mxu0 %v950_v9 }
 0x3dc   :  { %1855 = vmatprep.subr.bf16.mxu0 %v949_v11 }
 0x3df   :  { %1856 = vmatpush3.bf16.msra.mxu0 %v949_v11 }
 0x3e0   :  { %1857 = vmatprep.subr.bf16.mxu0 %v948_v30 }
 0x3e3   :  { %1858 = vmatpush3.bf16.msra.mxu0 %v948_v30 }
 0x3e4   :  { %1907 = vmatprep.subr.bf16.mxu0 %v2104_v24 }
 0x3e6   :  { %1860 = vmatmul.mubr.bf16.vlgmr.msra.gmra.mxu0 %v2097_v2 }
 0x3e7   :  { %1863 = vmatprep.mubr.bf16.mxu0 %v2098_v54 }
 0x3ee   :  { %1864 = vmatmul.mubr.bf16.gmra.mxu0 %v2099_v22 }
 0x3ef   :  { %1867 = vmatprep.mubr.bf16.mxu0 %v2100_v62 }
 0x3f6   :  { %1868 = vmatmul.mubr.bf16.gmra.mxu0 %v2101_v38 }
 0x3f7   :  { %1871 = vmatprep.mubr.bf16.mxu0 %v2102_v26 }
 0x3fe   :  { %1872 = vmatmul.mubr.bf16.gmra.mxu0 %v2103_v27 }
 0x3ff   :  { %1923 = vmatprep.mubr.msk.bf16.mxu0 %vm2105_vm1, %v2104_v24 }
 0x4a6   :  { %v1861_v25 = vpop.f32.mrf.mxu0 }
 0x4a8   :  { %v990_v33 = vpop.f32.mrf.mxu0 }
 0x4aa   :  { %v1862_v34 = vpop.f32.mrf.mxu0 }
 0x4ab   :  { %v1054_v29 = vpack.c.bf16 %v1862_v34, %v1861_v25 }
 0x4ac   :  { %v993_v45 = vpop.f32.mrf.mxu0 }
 0x4ad   :  { %v1053_v8 = vpack.c.bf16 %v993_v45, %v990_v33 }
 0x4ae   :  { %v1865_v49 = vpop.f32.mrf.mxu0 }
 0x4af   :  { %1891 = vmatprep.mubr.bf16.mxu1 %v1053_v8 }
 0x4b0   :  { %v1006_v36 = vpop.f32.mrf.mxu0  ;;  %1892 = vmatmul.mubr.bf16.vlgmr.msra.gmra.mxu1 %v1054_v29 }
 0x4b1   :  { %1928 = vmatpush3.bf16.msra.mxu1 %v1989_v35 }
 0x4b2   :  { %v1866_v15 = vpop.f32.mrf.mxu0  ;;  %1929 = vmatprep.subr.bf16.mxu1 %v2104_v24 }
 0x4b3   :  { %v1056_v19 = vpack.c.bf16 %v1866_v15, %v1865_v49 }
 0x4b4   :  { %v1009_v17 = vpop.f32.mrf.mxu0 }
 0x4b5   :  { %v1055_v18 = vpack.c.bf16 %v1009_v17, %v1006_v36  ;;  %1930 = vmatpush3.bf16.msra.mxu1 %v1990_v50 }
 0x4b6   :  { %v1869_v1 = vpop.f32.mrf.mxu0  ;;  %1931 = vmatprep.subr.bf16.mxu1 %v2104_v24 }
 0x4b7   :  { %1895 = vmatprep.mubr.bf16.mxu1 %v1055_v18 }
 0x4b8   :  { %v1022_v20 = vpop.f32.mrf.mxu0  ;;  %1896 = vmatmul.mubr.bf16.gmra.mxu1 %v1056_v19 }
 0x4b9   :  { %1932 = vmatpush3.bf16.msra.mxu1 %v1991_v51 }
 0x4ba   :  { %v1870_v21 = vpop.f32.mrf.mxu0  ;;  %1933 = vmatprep.subr.bf16.mxu1 %v2104_v24 }
 0x4bb   :  { %v1058_v12 = vpack.c.bf16 %v1870_v21, %v1869_v1 }
 0x4bc   :  { %v1025_v56 = vpop.f32.mrf.mxu0 }
 0x4bd   :  { %v1057_v37 = vpack.c.bf16 %v1025_v56, %v1022_v20  ;;  %1934 = vmatpush3.bf16.msra.mxu1 %v1992_v31 }
 0x4be   :  { %v1873_v39 = vpop.f32.mrf.mxu0  ;;  %1935 = vmatprep.subr.bf16.mxu1 %v2104_v24 }
 0x4bf   :  { %1899 = vmatprep.mubr.bf16.mxu1 %v1057_v37 }
 0x4c0   :  { %v1038_v40 = vpop.f32.mrf.mxu0  ;;  %1900 = vmatmul.mubr.bf16.gmra.mxu1 %v1058_v12 }
 0x4c1   :  { %1936 = vmatpush3.bf16.msra.mxu1 %v1993_v52 }
 0x4c2   :  { %v1874_v41 = vpop.f32.mrf.mxu0  ;;  %1937 = vmatprep.subr.bf16.mxu1 %v2104_v24 }
 0x4c3   :  { %v1060_v48 = vpack.c.bf16 %v1874_v41, %v1873_v39 }
 0x4c4   :  { %v1041_v28 = vpop.f32.mrf.mxu0 }
 0x4c5   :  { %v1059_v47 = vpack.c.bf16 %v1041_v28, %v1038_v40  ;;  %1938 = vmatpush3.bf16.msra.mxu1 %v1994_v5 }
 0x4c6   :  { %1939 = vmatprep.subr.bf16.mxu1 %v2104_v24 }
 0x4c7   :  { %1903 = vmatprep.mubr.bf16.mxu1 %v1059_v47 }
 0x4c8   :  { %1904 = vmatmul.mubr.bf16.gmra.mxu1 %v1060_v48 }
 0x4c9   :  { %1943 = vmatprep.mubr.msk.bf16.mxu1 %vm2105_vm1, %v2104_v24  ;;  %1940 = vmatpush3.bf16.msra.mxu1 %v1995_v58 }
 0x4ca   :  { %1941 = vmatprep.subr.bf16.mxu1 %v2104_v24 }
 0x570   :  { %v1893_v53 = vpop.f32.mrf.mxu1 }
 0x571   :  { %v2647_v56 = vadd.f32 %v1893_v53, %v1567_v6 }
 0x572   :  { %v2611_v46 = vpop.f32.mrf.mxu1 }
 0x573   :  { %v1247_v47 = vmin.f32 %v2647_v56, 0.0  ;;  %v2658_v51 = vadd.f32 %v1567_v6, %v2611_v46  ;;  %vm1231_vm0 = vcmp.gt.f32.partialorder %v2647_v56, 0.0 }
 0x574   :  { %v1894_v59 = vpop.f32.mrf.mxu1 }
 0x575   :  { %v2649_v37 = vadd.f32 %v1894_v59, %v1567_v6  ;;  %v1265_v53 = vmul.f32 1.442695, %v1247_v47  ;;  %vm1229_vm1 = vcmp.gt.f32.partialorder %v2658_v51, 0.0 }
 0x576   :  { %v1169_v60 = vpop.f32.mrf.mxu1 }
 0x577   :  { %v1248_v48 = vmin.f32 %v2649_v37, 0.0  ;;  %v2655_v35 = vadd.f32 %v1567_v6, %v1169_v60  ;;  %v1245_v60 = vmin.f32 %v2658_v51, 0.0  ;;  %vm1232_vm15 = vcmp.gt.f32.partialorder %v2649_v37, 0.0 }
 0x578   :  { %v1897_v57 = vpop.f32.mrf.mxu1 }
 0x579   :  { %v2638_v29 = vadd.f32 %v1897_v57, %v1567_v6  ;;  %v1267_v57 = vmul.f32 1.442695, %v1248_v48  ;;  %vm1230_vm2 = vcmp.gt.f32.partialorder %v2655_v35, 0.0 }
 0x57a   :  { %v1182_v14 = vpop.f32.mrf.mxu1 }
 0x57b   :  { %v2644_v1 = vadd.f32 %v1567_v6, %v1182_v14  ;;  %v1251_v20 = vmin.f32 %v2638_v29, 0.0  ;;  %v1246_v14 = vmin.f32 %v2655_v35, 0.0  ;;  %vm1235_vm12 = vcmp.gt.f32.partialorder %v2638_v29, 0.0 }
 0x57c   :  { %v1898_v7 = vpop.f32.mrf.mxu1 }
 0x57d   :  { %v2634_v33 = vadd.f32 %v1898_v7, %v1567_v6  ;;  %v1249_v40 = vmin.f32 %v2644_v1, 0.0  ;;  %v1273_v41 = vmul.f32 1.442695, %v1251_v20  ;;  %vm1233_vm14 = vcmp.gt.f32.partialorder %v2644_v1, 0.0 }
 0x57e   :  { %v1185_v63 = vpop.f32.mrf.mxu1 }
 0x57f   :  { %v1252_v17 = vmin.f32 %v2634_v33, 0.0  ;;  %v2642_v18 = vadd.f32 %v1567_v6, %v1185_v63  ;;  %v1269_v31 = vmul.f32 1.442695, %v1249_v40  ;;  %vm1236_vm11 = vcmp.gt.f32.partialorder %v2634_v33, 0.0 }
 0x580   :  { %v1901_v0 = vpop.f32.mrf.mxu1 }
 0x581   :  { %v2620_v44 = vadd.f32 %v1901_v0, %v1567_v6  ;;  %v1275_v12 = vmul.f32 1.442695, %v1252_v17  ;;  %v1250_v39 = vmin.f32 %v2642_v18, 0.0  ;;  %vm1234_vm13 = vcmp.gt.f32.partialorder %v2642_v18, 0.0 }
 0x582   :  { %v1198_v16 = vpop.f32.mrf.mxu1 }
 0x583   :  { %v1255_v38 = vmin.f32 %v2620_v44, 0.0  ;;  %v2630_v26 = vadd.f32 %v1567_v6, %v1198_v16  ;;  %v1271_v50 = vmul.f32 1.442695, %v1250_v39  ;;  %vm1239_vm8 = vcmp.gt.f32.partialorder %v2620_v44, 0.0 }
 0x584   :  { %v1902_v4 = vpop.f32.mrf.mxu1 }
 0x585   :  { %v2616_v9 = vadd.f32 %v1902_v4, %v1567_v6  ;;  %v1281_v49 = vmul.f32 1.442695, %v1255_v38  ;;  %v1253_v36 = vmin.f32 %v2630_v26, 0.0  ;;  %vm1237_vm10 = vcmp.gt.f32.partialorder %v2630_v26, 0.0 }
 0x586   :  { %v1201_v3 = vpop.f32.mrf.mxu1 }
 0x587   :  { %v1256_v55 = vmin.f32 %v2616_v9, 0.0  ;;  %v2627_v54 = vadd.f32 %v1567_v6, %v1201_v3  ;;  %v1277_v21 = vmul.f32 1.442695, %v1253_v36  ;;  %vm1240_vm7 = vcmp.gt.f32.partialorder %v2616_v9, 0.0 }
 0x588   :  { %v1905_v13 = vpop.f32.mrf.mxu1 }
 0x589   :  { %v2618_v10 = vadd.f32 %v1905_v13, %v1567_v6  ;;  %v1283_v25 = vmul.f32 1.442695, %v1256_v55  ;;  %v1254_v34 = vmin.f32 %v2627_v54, 0.0  ;;  %v1263_v13 = vmul.f32 1.442695, %v1246_v14 }
 0x58a   :  { %v1214_v61 = vpop.f32.mrf.mxu1  ;;  %v1261_v55 = vmul.f32 1.442695, %v1245_v60  ;;  %vm1238_vm9 = vcmp.gt.f32.partialorder %v2627_v54, 0.0 }
 0x58b   :  { %v1259_v23 = vmin.f32 %v2618_v10, 0.0  ;;  %v2623_v11 = vadd.f32 %v1567_v6, %v1214_v61  ;;  %v1279_v19 = vmul.f32 1.442695, %v1254_v34  ;;  %vm1243_vm3 = vcmp.gt.f32.partialorder %v2618_v10, 0.0 }
 0x58c   :  { %v1906_v43 = vpop.f32.mrf.mxu1 }
 0x58d   :  { %v1289_v30 = vmul.f32 1.442695, %v1259_v23  ;;  %v1257_v2 = vmin.f32 %v2623_v11, 0.0  ;;  %v1226_v22 = vadd.f32 %v1906_v43, %v1567_v6  ;;  %vm1241_vm6 = vcmp.gt.f32.partialorder %v2623_v11, 0.0 }
 0x58e   :  { %v1217_v62 = vpop.f32.mrf.mxu1 }
 0x58f   :  { %2061 = vpow2.f32 %v1289_v30  ;;  %v1285_v27 = vmul.f32 1.442695, %v1257_v2  ;;  %v1260_v42 = vmin.f32 %v1226_v22, 0.0  ;;  %v2632_v32 = vadd.f32 %v1567_v6, %v1217_v62 }
 0x590   :  { %vm1244_vm4 = vcmp.gt.f32.partialorder %v1226_v22, 0.0 }
 0x591   :  { %v1291_v45 = vmul.f32 1.442695, %v1260_v42  ;;  %v1258_v8 = vmin.f32 %v2632_v32, 0.0  ;;  %2063 = vpow2.f32 %v1285_v27  ;;  %vm1242_vm5 = vcmp.gt.f32.partialorder %v2632_v32, 0.0 }
 0x593   :  { %2065 = vpow2.f32 %v1291_v45  ;;  %v1287_v15 = vmul.f32 1.442695, %v1258_v8 }
 0x594   :  { %2067 = vpow2.f32 %v1283_v25 }
 0x595   :  { %2069 = vpow2.f32 %v1287_v15 }
 0x596   :  { %2071 = vpow2.f32 %v1281_v49 }
 0x597   :  { %2073 = vpow2.f32 %v1279_v19 }
 0x598   :  { %2075 = vpow2.f32 %v1277_v21 }
 0x599   :  { %2077 = vpow2.f32 %v1275_v12 }
 0x59a   :  { %2079 = vpow2.f32 %v1273_v41 }
 0x59b   :  { %2081 = vpow2.f32 %v1271_v50 }
 0x59c   :  { %v2062_v28 = vpop.eup %2061  ;;  %2083 = vpow2.f32 %v1269_v31 }
 0x59d   :  { %v1590_v5 = vadd.f32 -1.0, %v2062_v28  ;;  %2085 = vpow2.f32 %v1267_v57 }
 0x59e   :  { %v2064_v52 = vpop.eup %2063  ;;  %2087 = vpow2.f32 %v1265_v53 }
 0x59f   :  { %v1323_v46 = vsel %vm1243_vm3, %v2618_v10, %v1590_v5  ;;  %v1588_v0 = vadd.f32 -1.0, %v2064_v52  ;;  %2089 = vpow2.f32 %v1263_v13  ;;  %v1996_v5 = vld [vmem:[%s2718_s9] sm:$0xff]  }
 0x5a0   :  { %v2066_v58 = vpop.eup %2065  ;;  %2091 = vpow2.f32 %v1261_v55  ;;  %1942 = vmatpush3.bf16.msra.mxu1 %v1996_v5 }
 0x5a1   :  { %v2068_v59 = vpop.eup %2067  ;;  %v1591_v7 = vadd.f32 -1.0, %v2066_v58  ;;  %v1321_v10 = vsel %vm1241_vm6, %v2623_v11, %v1588_v0 }
 0x5a2   :  { %v2070_v63 = vpop.eup %2069  ;;  %v1587_v61 = vadd.f32 -1.0, %v2068_v59 }
 0x5a3   :  { %v1324_v16 = vsel %vm1244_vm4, %v1226_v22, %v1591_v7  ;;  %v1589_v4 = vadd.f32 -1.0, %v2070_v63  ;;  %v2072_v3 = vpop.eup %2071 }
 0x5a4   :  { %v1332_v6 = vpack.c.bf16 %v1324_v16, %v1323_v46  ;;  %v2074_v43 = vpop.eup %2073  ;;  %v1586_v30 = vadd.f32 -1.0, %v2072_v3  ;;  %v1320_v62 = vsel %vm1240_vm7, %v2616_v9, %v1587_v61 }
 0x5a5   :  { %v1322_v23 = vsel %vm1242_vm5, %v2632_v32, %v1589_v4  ;;  %v2076_v2 = vpop.eup %2075  ;;  %v1585_v38 = vadd.f32 -1.0, %v2074_v43 }
 0x5a6   :  { %1908 = vmatpush3.bf16.msra.mxu0 %v1332_v6  ;;  %v1331_v22 = vpack.c.bf16 %v1322_v23, %v1321_v10  ;;  %v2078_v27 = vpop.eup %2077  ;;  %v1319_v42 = vsel %vm1239_vm8, %v2620_v44, %v1586_v30  ;;  %v1584_v32 = vadd.f32 -1.0, %v2076_v2 }
 0x5a7   :  { %1909 = vmatprep.subr.bf16.mxu0 %v2104_v24  ;;  %v2080_v11 = vpop.eup %2079  ;;  %v1330_v25 = vpack.c.bf16 %v1320_v62, %v1319_v42  ;;  %v1583_v34 = vadd.f32 -1.0, %v2078_v27  ;;  %v1318_v45 = vsel %vm1238_vm9, %v2627_v54, %v1585_v38 }
 0x5a8   :  { %v2082_v8 = vpop.eup %2081  ;;  %v1582_v49 = vadd.f32 -1.0, %v2080_v11  ;;  %v1317_v36 = vsel %vm1237_vm10, %v2630_v26, %v1584_v32 }
 0x5a9   :  { %v2084_v9 = vpop.eup %2083  ;;  %v1329_v44 = vpack.c.bf16 %v1318_v45, %v1317_v36  ;;  %v1316_v15 = vsel %vm1236_vm11, %v2634_v33, %v1583_v34  ;;  %v1581_v17 = vadd.f32 -1.0, %v2082_v8 }
 0x5aa   :  { %1910 = vmatpush3.bf16.msra.mxu0 %v1331_v22  ;;  %v2086_v19 = vpop.eup %2085  ;;  %v1315_v54 = vsel %vm1235_vm12, %v2638_v29, %v1582_v49  ;;  %v1580_v20 = vadd.f32 -1.0, %v2084_v9 }
 0x5ab   :  { %1911 = vmatprep.subr.bf16.mxu0 %v2104_v24  ;;  %v2088_v21 = vpop.eup %2087  ;;  %v1328_v12 = vpack.c.bf16 %v1316_v15, %v1315_v54  ;;  %v1579_v26 = vadd.f32 -1.0, %v2086_v19  ;;  %v1314_v39 = vsel %vm1234_vm13, %v2642_v18, %v1581_v17 }
 0x5ac   :  { %v2090_v40 = vpop.eup %2089  ;;  %v1578_v33 = vadd.f32 -1.0, %v2088_v21  ;;  %v1313_v41 = vsel %vm1233_vm14, %v2644_v1, %v1580_v20 }
 0x5ad   :  { %v2092_v29 = vpop.eup %2091  ;;  %v1327_v28 = vpack.c.bf16 %v1314_v39, %v1313_v41  ;;  %v1312_v47 = vsel %vm1232_vm15, %v2649_v37, %v1579_v26  ;;  %v1577_v48 = vadd.f32 -1.0, %v2090_v40 }
 0x5ae   :  { %1912 = vmatpush3.bf16.msra.mxu0 %v1330_v25  ;;  %v1311_v18 = vsel %vm1231_vm0, %v2647_v56, %v1578_v33  ;;  %v1576_v50 = vadd.f32 -1.0, %v2092_v29  ;;  %v1333_v56 = vld [vmem:[%s2720_s8] sm:$0xf] }
 0x5af   :  { %1913 = vmatprep.subr.bf16.mxu0 %v2104_v24  ;;  %v1326_v31 = vpack.c.bf16 %v1312_v47, %v1311_v18  ;;  %v1310_v1 = vsel %vm1230_vm2, %v2655_v35, %v1577_v48 }
 0x5b0   :  { %v1309_v52 = vsel %vm1229_vm1, %v2658_v51, %v1576_v50 }
 0x5b1   :  { %v1325_v37 = vpack.c.bf16 %v1310_v1, %v1309_v52 }
 0x5b2   :  { %1914 = vmatpush3.bf16.msra.mxu0 %v1329_v44 }
 0x5b3   :  { %1915 = vmatprep.subr.bf16.mxu0 %v2104_v24 }
 0x5b6   :  { %1916 = vmatpush3.bf16.msra.mxu0 %v1328_v12 }
 0x5b7   :  { %1917 = vmatprep.subr.bf16.mxu0 %v2104_v24 }
 0x5ba   :  { %1918 = vmatpush3.bf16.msra.mxu0 %v1327_v28 }
 0x5bb   :  { %1919 = vmatprep.subr.bf16.mxu0 %v2104_v24 }
 0x5be   :  { %1920 = vmatpush3.bf16.msra.mxu0 %v1326_v31 }
 0x5bf   :  { %1921 = vmatprep.subr.bf16.mxu0 %v2104_v24  ;;  %v1592_v24 = vld [vmem:[%s2721_s10] ss:$0 sm:$0xff] }
 0x5c2   :  { %1922 = vmatpush3.bf16.msra.mxu0 %v1325_v37 }
 0x5c5   :  { %1924 = vmatmul.mubr.bf16.vlgmr.msra.gmra.mxu0 %v1333_v56 }
 0x685   :  { %v1368_v35 = vpop.f32.mrf.mxu0 }
 0x686   :  { %v1374_v58 = vpack.c.bf16 %v1368_v35, %v1368_v35 }
 0x687   :  { %v1925_v53 = vpop.f32.mrf.mxu0 }
 0x688   :  { %1944 = vmatmul.mubr.bf16.vlgmr.msra.gmra.mxu1 %v1374_v58 }
 0x689   :  { %v1371_v59 = vpop.f32.mrf.mxu0 }
 0x68b   :  { %v1926_v51 = vpop.f32.mrf.mxu0 }
 0x748   :  { %v1480_v57 = vpop.f32.mrf.mxu1 }
 0x749   :  { %v1481_v14 = vadd.f32 %v1592_v24, %v1480_v57 }
 0x74a   :  { %v1945_v7 = vpop.f32.mrf.mxu1 }
 0x74b   :  { %1486 = vmax.xlane.f32.xlu0 %v1481_v14 }
 0x74c   :  { %v1483_v63 = vpop.f32.mrf.mxu1 }
 0x74e   :  { %v1946_v60 = vpop.f32.mrf.mxu1 }
 0x7d4   :  { %v1487_v46 = vpop.xlane.xlu0 %1486 }
 0x7d5   :  { %v1488_v0 = vsub.f32 %v1481_v14, %v1487_v46 }
 0x7d7   :  { %v1489_v16 = vmul.f32 1.442695, %v1488_v0 }
 0x7d9   :  { %2093 = vpow2.f32 %v1489_v16 }
 0x7e6   :  { %v2094_v4 = vpop.eup %2093 }
 0x7e7   :  { %1491 = vadd.xlane.f32.xlu0 %v2094_v4 }
 0x870   :  { %v1492_v3 = vpop.xlane.xlu0 %1491 }
 0x871   :  { %2095 = vlog2.f32 %v1492_v3 }
 0x87e   :  { %v2096_v6 = vpop.eup %2095 }
 0x87f   :  { %v1494_v13 = vmul.f32 0.6931472, %v2096_v6 }
 0x881   :  { %v1495_v61 = vsub.f32 %v1488_v0, %v1494_v13 }
 0x883   :  { %1496 = vst [vmem:[%s2722_s11] sm:$0xff] %v1495_v61 }

</bundles_post_ra>
